<compile_context>
chip_gen: v5e
topology: v5e:2x2
jax: 0.10.0
libtpu: 0.0.40
codegen_flags: <defaults>
</compile_context>

<pallas_src>
import jax
import jax.numpy as jnp
from jax.experimental import pallas as pl
from jax.experimental.pallas import tpu as pltpu


# ----------------------------- model config --------------------------------
B, T, N = 2, 8, 4            # batch, encoder sequence length, "nodes"
IN_DIM = 2                   # per-node feature dim (matches module default)
EMBED = 32                   # embed_dim (scaled down from 128)
HIDDEN = 32                  # hidden_dim (scaled down from 256)
OUT_LEN = 5                  # output_length
OUT_DIM = 2                  # self.output_dim
BN = B * N                   # 8 rows  -> one f32 sublane tile
G4 = 4 * HIDDEN              # 128 lanes -> gates tile is exactly one f32 vreg
XPAD = 8                     # input feature dim padded to one sublane tile

# weight-slab row offsets (every start/size a multiple of 8 -> aligned views)
_R_EX0 = 0                   # (8,128)  fused  w_in @ e_wih0   (rows 2..7 zero)
_R_EH0 = 8                   # (32,128) e_whh0
_R_EX1 = 40                  # (32,128) e_wih1
_R_EH1 = 72                  # (32,128) e_whh1
_R_DX0 = 104                 # (8,128)  fused  w_in @ d_wih0   (rows 2..7 zero)
_R_DH0 = 112                 # (32,128) d_whh0
_R_DX1 = 144                 # (32,128) d_wih1
_R_DH1 = 176                 # (32,128) d_whh1
_R_FF = 208                  # (32,128) fused (w_out@w_in)@d_wih0
_R_OUT = 240                 # (32,128) w_out padded to 128 lanes (unscaled)
W_SLAB_ROWS = 272


def _gates_to_hc(gates, c):
    """LSTM gate block -> (h, c). Gate order i, f, g, o.

    i/f/o weight columns and biases were pre-scaled by 0.5 wrapper-side, so a
    single tanh EUP pass over the whole (8,128) vreg gives tanh(z/2) on those
    lanes; sigmoid(z) = 0.5*tanh(z/2) + 0.5 is a VPU fixup."""
    t = jnp.tanh(gates)
    i = 0.5 * t[:, 0 * HIDDEN:1 * HIDDEN] + 0.5
    f = 0.5 * t[:, 1 * HIDDEN:2 * HIDDEN] + 0.5
    g = t[:, 2 * HIDDEN:3 * HIDDEN]
    o = 0.5 * t[:, 3 * HIDDEN:4 * HIDDEN] + 0.5
    c_new = f * c + i * g
    h_new = o * jnp.tanh(c_new)
    return h_new, c_new


def dual_transformer_kernel(x_ref, w_ref, b_ref, out_ref, dh1_scr):
    # ---------------- prologue: biases + hoisted batched x-projections ------
    b = b_ref[...]                                              # (8, 128)
    b_ex0 = jnp.broadcast_to(b[0:1, :], (T * BN, G4))           # enc L0 (fused)
    b_e1 = jnp.broadcast_to(b[1:2, :], (BN, G4))                # enc L1
    b_dx0s = jnp.broadcast_to(b[2:3, :], (BN, G4))              # dec seed
    b_ff = jnp.broadcast_to(b[3:4, :], (BN, G4))                # dec feedback
    b_d1 = jnp.broadcast_to(b[4:5, :], (BN, G4))                # dec L1
    b_out = jnp.broadcast_to(b[5:6, :], (OUT_LEN * BN, G4))     # out_fc

    # encoder layer-0 x-side for all time steps (input_fc fused in):
    xproj0_all = (jnp.dot(x_ref[...], w_ref[_R_EX0:_R_EX0 + 8, :],
                          preferred_element_type=jnp.float32) + b_ex0)

    # decoder seed x-side (last embedded time step, fused through d_wih0):
    xside0 = (jnp.dot(x_ref[(T - 1) * BN:T * BN, :],
                      w_ref[_R_DX0:_R_DX0 + 8, :],
                      preferred_element_type=jnp.float32) + b_dx0s)

    zeros_h = jnp.zeros((BN, HIDDEN), jnp.float32)
    h0, c0, h1, c1 = zeros_h, zeros_h, zeros_h, zeros_h

    # ------------------------- encoder (2-layer LSTM) -----------------------
    w_eh0 = w_ref[_R_EH0:_R_EH0 + HIDDEN, :]
    w_ex1 = w_ref[_R_EX1:_R_EX1 + HIDDEN, :]
    w_eh1 = w_ref[_R_EH1:_R_EH1 + HIDDEN, :]
    for t in range(T):                                           # static unroll
        # layer 0: prev-state matmul + precomputed x-projection (bias folded)
        gates0 = (jnp.dot(h0, w_eh0, preferred_element_type=jnp.float32)
                  + xproj0_all[t * BN:(t + 1) * BN, :])
        h0, c0 = _gates_to_hc(gates0, c0)
        # layer 1: two split matmuls (prev-state one listed first)
        gates1 = (jnp.dot(h1, w_eh1, preferred_element_type=jnp.float32)
                  + jnp.dot(h0, w_ex1, preferred_element_type=jnp.float32)
                  + b_e1)
        h1, c1 = _gates_to_hc(gates1, c1)

    # ---------------- decoder (2-layer LSTM, autoregressive) ----------------
    w_dh0 = w_ref[_R_DH0:_R_DH0 + HIDDEN, :]
    w_dx1 = w_ref[_R_DX1:_R_DX1 + HIDDEN, :]
    w_dh1 = w_ref[_R_DH1:_R_DH1 + HIDDEN, :]
    w_ff = w_ref[_R_FF:_R_FF + HIDDEN, :]

    dh0, dc0, dh1, dc1 = h0, c0, h1, c1                          # encoder seeds
    for t in range(OUT_LEN):                                     # static unroll
        # layer 0: feedback already folded into xside0 (depends only on
        # previous-step dh1), so both matmuls issue back-to-back at step start
        gates0 = (jnp.dot(dh0, w_dh0, preferred_element_type=jnp.float32)
                  + xside0)
        dh0, dc0 = _gates_to_hc(gates0, dc0)
        gates1 = (jnp.dot(dh1, w_dh1, preferred_element_type=jnp.float32)
                  + jnp.dot(dh0, w_dx1, preferred_element_type=jnp.float32)
                  + b_d1)
        dh1, dc1 = _gates_to_hc(gates1, dc1)
        dh1_scr[t * BN:(t + 1) * BN, :] = dh1                    # idle store slot
        if t + 1 < OUT_LEN:
            # fused feedback: (dh1@w_out + b_out)@w_in + b_in, then @d_wih0
            xside0 = (jnp.dot(dh1, w_ff, preferred_element_type=jnp.float32)
                      + b_ff)

    # -------- batched output projection, lane-dense single store ------------
    preds = (jnp.dot(dh1_scr[...], w_ref[_R_OUT:_R_OUT + HIDDEN, :],
                     preferred_element_type=jnp.float32) + b_out)
    out_ref[...] = preds


# ------------------------------ params --------------------------------------
def init_params(key):
    """Deterministic init mimicking PyTorch default uniform ranges."""
    def u(key, shape, fan_in):
        bound = 1.0 / jnp.sqrt(jnp.float32(fan_in))
        return jax.random.uniform(key, shape, jnp.float32, -bound, bound)

    keys = jax.random.split(key, 20)
    p = {}
    p["w_in"] = u(keys[0], (IN_DIM, EMBED), IN_DIM)
    p["b_in"] = u(keys[1], (1, EMBED), IN_DIM)

    def lstm_layer(k0, k1, k2, in_size):
        w_ih = u(k0, (in_size, 4 * HIDDEN), HIDDEN)
        w_hh = u(k1, (HIDDEN, 4 * HIDDEN), HIDDEN)
        b = u(k2, (1, 4 * HIDDEN), HIDDEN)   # combined b_ih + b_hh
        return w_ih, w_hh, b

    p["e_wih0"], p["e_whh0"], p["e_b0"] = lstm_layer(keys[2], keys[3], keys[4], EMBED)
    p["e_wih1"], p["e_whh1"], p["e_b1"] = lstm_layer(keys[5], keys[6], keys[7], HIDDEN)
    p["d_wih0"], p["d_whh0"], p["d_b0"] = lstm_layer(keys[8], keys[9], keys[10], EMBED)
    p["d_wih1"], p["d_whh1"], p["d_b1"] = lstm_layer(keys[11], keys[12], keys[13], HIDDEN)

    p["w_out"] = u(keys[14], (HIDDEN, OUT_DIM), HIDDEN)
    p["b_out"] = u(keys[15], (1, OUT_DIM), HIDDEN)
    return p


# ------------------------------ wrapper --------------------------------------
@jax.jit
def model_forward(x, params):
    """x: (B, T, N, IN_DIM) float32 -> (B, OUT_LEN, N, OUT_DIM)."""
    # Time-major flat input: row index = t*BN + (b*N + n); pad features to 8.
    x_tm = jnp.transpose(x, (1, 0, 2, 3)).reshape(T * BN, IN_DIM)
    x_pad = jnp.pad(x_tm, ((0, 0), (0, XPAD - IN_DIM)))

    # 0.5 pre-scale on i/f/o gate columns -> kernel needs a single tanh pass.
    gate_scale = jnp.concatenate([
        jnp.full((HIDDEN,), 0.5), jnp.full((HIDDEN,), 0.5),
        jnp.ones((HIDDEN,)), jnp.full((HIDDEN,), 0.5)]).astype(jnp.float32)[None, :]

    w_in, b_in = params["w_in"], params["b_in"]
    # ---- wrapper-side fusions (tiny XLA matmuls, params-only) ----
    W_ex0 = (w_in @ params["e_wih0"]) * gate_scale                      # (2,4H)
    b_ex0 = (b_in @ params["e_wih0"] + params["e_b0"]) * gate_scale
    W_eh0 = params["e_whh0"] * gate_scale
    W_ex1 = params["e_wih1"] * gate_scale
    W_eh1 = params["e_whh1"] * gate_scale
    b_e1 = params["e_b1"] * gate_scale

    W_dx0s = (w_in @ params["d_wih0"]) * gate_scale                     # (2,4H)
    b_dx0s = (b_in @ params["d_wih0"] + params["d_b0"]) * gate_scale
    W_dh0 = params["d_whh0"] * gate_scale
    W_dx1 = params["d_wih1"] * gate_scale
    W_dh1 = params["d_whh1"] * gate_scale
    b_d1 = params["d_b1"] * gate_scale
    W_ff = (params["w_out"] @ w_in @ params["d_wih0"]) * gate_scale     # (H,4H)
    b_ff = ((params["b_out"] @ w_in + b_in) @ params["d_wih0"]
            + params["d_b0"]) * gate_scale

    w_out_pad = jnp.pad(params["w_out"], ((0, 0), (0, G4 - OUT_DIM)))   # (H,128)
    b_out_pad = jnp.pad(params["b_out"], ((0, 0), (0, G4 - OUT_DIM)))   # (1,128)

    def pad_rows(w, rows):
        return jnp.pad(w, ((0, rows - w.shape[0]), (0, 0)))

    w_slab = jnp.concatenate([
        pad_rows(W_ex0, 8),        # rows   0:  8
        W_eh0,                     # rows   8: 40
        W_ex1,                     # rows  40: 72
        W_eh1,                     # rows  72:104
        pad_rows(W_dx0s, 8),       # rows 104:112
        W_dh0,                     # rows 112:144
        W_dx1,                     # rows 144:176
        W_dh1,                     # rows 176:208
        W_ff,                      # rows 208:240
        w_out_pad,                 # rows 240:272
    ], axis=0)                     # (272, 128)

    b_slab = jnp.concatenate([
        b_ex0, b_e1, b_dx0s, b_ff, b_d1, b_out_pad,
        jnp.zeros((2, G4), jnp.float32),
    ], axis=0)                     # (8, 128)

    preds_wide = pl.pallas_call(
        dual_transformer_kernel,
        out_shape=jax.ShapeDtypeStruct((OUT_LEN * BN, G4), jnp.float32),
        in_specs=[pl.BlockSpec(memory_space=pltpu.MemorySpace.VMEM)] * 3,
        out_specs=pl.BlockSpec(memory_space=pltpu.MemorySpace.VMEM),
        scratch_shapes=[pltpu.VMEM((OUT_LEN * BN, HIDDEN), jnp.float32)],
    )(x_pad, w_slab, b_slab)

    preds = preds_wide[:, :OUT_DIM]                              # (L*B*N, 2)
    # torch.cat(outputs).view(B, L, N, 2): flat reinterpretation of the
    # time-major buffer, identical to a raw .view.
    return preds.reshape(B, OUT_LEN, N, OUT_DIM)


# ------------------------------ reference ------------------------------------
def _lstm_cell_ref(x, h, c, w_ih, w_hh, b):
    gates = x @ w_ih + h @ w_hh + b
    i = jax.nn.sigmoid(gates[:, 0 * HIDDEN:1 * HIDDEN])
    f = jax.nn.sigmoid(gates[:, 1 * HIDDEN:2 * HIDDEN])
    g = jnp.tanh(gates[:, 2 * HIDDEN:3 * HIDDEN])
    o = jax.nn.sigmoid(gates[:, 3 * HIDDEN:4 * HIDDEN])
    c_new = f * c + i * g
    return o * jnp.tanh(c_new), c_new


def reference_forward(x, params):
    """Pure-JAX reference mirroring the PyTorch forward (unfused weights)."""
    x_flat = jnp.transpose(x, (0, 2, 1, 3)).reshape(BN, T, IN_DIM)
    emb = x_flat @ params["w_in"] + params["b_in"]                 # (BN, T, EMBED)

    zeros_h = jnp.zeros((BN, HIDDEN), jnp.float32)
    h0, c0, h1, c1 = zeros_h, zeros_h, zeros_h, zeros_h
    for t in range(T):
        h0, c0 = _lstm_cell_ref(emb[:, t, :], h0, c0,
                                params["e_wih0"], params["e_whh0"], params["e_b0"])
        h1, c1 = _lstm_cell_ref(h0, h1, c1,
                                params["e_wih1"], params["e_whh1"], params["e_b1"])

    dec_in = emb[:, -1, :]
    dh0, dc0, dh1, dc1 = h0, c0, h1, c1
    outs = []
    for t in range(OUT_LEN):
        dh0, dc0 = _lstm_cell_ref(dec_in, dh0, dc0,
                                  params["d_wih0"], params["d_whh0"], params["d_b0"])
        dh1, dc1 = _lstm_cell_ref(dh0, dh1, dc1,
                                  params["d_wih1"], params["d_whh1"], params["d_b1"])
        pred = dh1 @ params["w_out"] + params["b_out"]
        outs.append(pred.reshape(B, N, OUT_DIM))
        dec_in = pred @ params["w_in"] + params["b_in"]
    stacked = jnp.concatenate(outs, axis=0)                        # (L*B, N, 2)
    return stacked.reshape(B, OUT_LEN, N, OUT_DIM)


if __name__ == "__main__":
    key = jax.random.PRNGKey(0)
    k_x, k_p = jax.random.split(key)
    x = jax.random.normal(k_x, (B, T, N, IN_DIM), jnp.float32)
    params = init_params(k_p)

    out = model_forward(x, params)
    out = jax.block_until_ready(out)

    ref = reference_forward(x, params)
    assert out.shape == (B, OUT_LEN, N, OUT_DIM), out.shape
    assert jnp.allclose(out, ref, atol=2e-3, rtol=2e-3), (
        "mismatch vs reference", float(jnp.max(jnp.abs(out - ref))))

    print("KERNEL_OK")
</pallas_src>

<mosaic_0001>
module attributes {stable_mosaic.version = 11 : i64} {
  func.func @dual_transformer_kernel(%arg0: memref<64x8xf32, #tpu.memory_space<vmem>>, %arg1: memref<272x128xf32, #tpu.memory_space<vmem>>, %arg2: memref<8x128xf32, #tpu.memory_space<vmem>>, %arg3: memref<40x128xf32, #tpu.memory_space<vmem>>, %arg4: memref<40x32xf32, #tpu.memory_space<vmem>>) attributes {dimension_semantics = [], scalar_prefetch = 0 : i64, scratch_operands = 1 : i64, tpu.core_type = #tpu.core_type<tc>} {
    %c0 = arith.constant 0 : index
    %c0_0 = arith.constant 0 : index
    %0 = vector.load %arg2[%c0, %c0_0] : memref<8x128xf32, #tpu.memory_space<vmem>>, vector<8x128xf32>
    %1 = vector.extract_strided_slice %0 {offsets = [0, 0], sizes = [1, 128], strides = [1, 1]} : vector<8x128xf32> to vector<1x128xf32>
    %2 = vector.shape_cast %1 : vector<1x128xf32> to vector<1x128xf32>
    %3 = vector.broadcast %2 : vector<1x128xf32> to vector<64x128xf32>
    %4 = vector.extract_strided_slice %0 {offsets = [1, 0], sizes = [1, 128], strides = [1, 1]} : vector<8x128xf32> to vector<1x128xf32>
    %5 = vector.shape_cast %4 : vector<1x128xf32> to vector<1x128xf32>
    %6 = vector.broadcast %5 : vector<1x128xf32> to vector<8x128xf32>
    %7 = vector.extract_strided_slice %0 {offsets = [2, 0], sizes = [1, 128], strides = [1, 1]} : vector<8x128xf32> to vector<1x128xf32>
    %8 = vector.shape_cast %7 : vector<1x128xf32> to vector<1x128xf32>
    %9 = vector.broadcast %8 : vector<1x128xf32> to vector<8x128xf32>
    %10 = vector.extract_strided_slice %0 {offsets = [3, 0], sizes = [1, 128], strides = [1, 1]} : vector<8x128xf32> to vector<1x128xf32>
    %11 = vector.shape_cast %10 : vector<1x128xf32> to vector<1x128xf32>
    %12 = vector.broadcast %11 : vector<1x128xf32> to vector<8x128xf32>
    %13 = vector.extract_strided_slice %0 {offsets = [4, 0], sizes = [1, 128], strides = [1, 1]} : vector<8x128xf32> to vector<1x128xf32>
    %14 = vector.shape_cast %13 : vector<1x128xf32> to vector<1x128xf32>
    %15 = vector.broadcast %14 : vector<1x128xf32> to vector<8x128xf32>
    %16 = vector.extract_strided_slice %0 {offsets = [5, 0], sizes = [1, 128], strides = [1, 1]} : vector<8x128xf32> to vector<1x128xf32>
    %17 = vector.shape_cast %16 : vector<1x128xf32> to vector<1x128xf32>
    %18 = vector.broadcast %17 : vector<1x128xf32> to vector<40x128xf32>
    %c0_1 = arith.constant 0 : index
    %c0_2 = arith.constant 0 : index
    %19 = vector.load %arg0[%c0_1, %c0_2] : memref<64x8xf32, #tpu.memory_space<vmem>>, vector<64x8xf32>
    %c0_3 = arith.constant 0 : index
    %c0_4 = arith.constant 0 : index
    %20 = vector.load %arg1[%c0_3, %c0_4] : memref<272x128xf32, #tpu.memory_space<vmem>>, vector<8x128xf32>
    %cst = arith.constant dense<0.000000e+00> : vector<64x128xf32>
    %21 = tpu.matmul %19, %20, %cst {dimension_numbers = #tpu.dot_dimension_numbers<[1], [0], [0], [1], [0, 0, 1, 1], [], []>} : vector<64x8xf32>, vector<8x128xf32>, vector<64x128xf32> -> vector<64x128xf32>
    %22 = arith.addf %21, %3 : vector<64x128xf32>
    %c56 = arith.constant 56 : index
    %c0_5 = arith.constant 0 : index
    %23 = vector.load %arg0[%c56, %c0_5] : memref<64x8xf32, #tpu.memory_space<vmem>>, vector<8x8xf32>
    %c104 = arith.constant 104 : index
    %c0_6 = arith.constant 0 : index
    %24 = vector.load %arg1[%c104, %c0_6] : memref<272x128xf32, #tpu.memory_space<vmem>>, vector<8x128xf32>
    %cst_7 = arith.constant dense<0.000000e+00> : vector<8x128xf32>
    %25 = tpu.matmul %23, %24, %cst_7 {dimension_numbers = #tpu.dot_dimension_numbers<[1], [0], [0], [1], [0, 0, 1, 1], [], []>} : vector<8x8xf32>, vector<8x128xf32>, vector<8x128xf32> -> vector<8x128xf32>
    %26 = arith.addf %25, %9 : vector<8x128xf32>
    %cst_8 = arith.constant 0.000000e+00 : f32
    %27 = vector.broadcast %cst_8 : f32 to vector<8x32xf32>
    %c8 = arith.constant 8 : index
    %c0_9 = arith.constant 0 : index
    %28 = vector.load %arg1[%c8, %c0_9] : memref<272x128xf32, #tpu.memory_space<vmem>>, vector<32x128xf32>
    %c40 = arith.constant 40 : index
    %c0_10 = arith.constant 0 : index
    %29 = vector.load %arg1[%c40, %c0_10] : memref<272x128xf32, #tpu.memory_space<vmem>>, vector<32x128xf32>
    %c72 = arith.constant 72 : index
    %c0_11 = arith.constant 0 : index
    %30 = vector.load %arg1[%c72, %c0_11] : memref<272x128xf32, #tpu.memory_space<vmem>>, vector<32x128xf32>
    %cst_12 = arith.constant dense<0.000000e+00> : vector<8x128xf32>
    %31 = tpu.matmul %27, %28, %cst_12 {dimension_numbers = #tpu.dot_dimension_numbers<[1], [0], [0], [1], [0, 0, 1, 1], [], []>} : vector<8x32xf32>, vector<32x128xf32>, vector<8x128xf32> -> vector<8x128xf32>
    %32 = vector.extract_strided_slice %22 {offsets = [0, 0], sizes = [8, 128], strides = [1, 1]} : vector<64x128xf32> to vector<8x128xf32>
    %33 = arith.addf %31, %32 : vector<8x128xf32>
    %34 = math.tanh %33 : vector<8x128xf32>
    %35 = vector.extract_strided_slice %34 {offsets = [0, 0], sizes = [8, 32], strides = [1, 1]} : vector<8x128xf32> to vector<8x32xf32>
    %cst_13 = arith.constant 5.000000e-01 : f32
    %36 = vector.broadcast %cst_13 : f32 to vector<8x32xf32>
    %37 = arith.mulf %36, %35 : vector<8x32xf32>
    %cst_14 = arith.constant 5.000000e-01 : f32
    %38 = vector.broadcast %cst_14 : f32 to vector<8x32xf32>
    %39 = arith.addf %37, %38 : vector<8x32xf32>
    %40 = vector.extract_strided_slice %34 {offsets = [0, 32], sizes = [8, 32], strides = [1, 1]} : vector<8x128xf32> to vector<8x32xf32>
    %cst_15 = arith.constant 5.000000e-01 : f32
    %41 = vector.broadcast %cst_15 : f32 to vector<8x32xf32>
    %42 = arith.mulf %41, %40 : vector<8x32xf32>
    %cst_16 = arith.constant 5.000000e-01 : f32
    %43 = vector.broadcast %cst_16 : f32 to vector<8x32xf32>
    %44 = arith.addf %42, %43 : vector<8x32xf32>
    %45 = vector.extract_strided_slice %34 {offsets = [0, 64], sizes = [8, 32], strides = [1, 1]} : vector<8x128xf32> to vector<8x32xf32>
    %46 = vector.extract_strided_slice %34 {offsets = [0, 96], sizes = [8, 32], strides = [1, 1]} : vector<8x128xf32> to vector<8x32xf32>
    %cst_17 = arith.constant 5.000000e-01 : f32
    %47 = vector.broadcast %cst_17 : f32 to vector<8x32xf32>
    %48 = arith.mulf %47, %46 : vector<8x32xf32>
    %cst_18 = arith.constant 5.000000e-01 : f32
    %49 = vector.broadcast %cst_18 : f32 to vector<8x32xf32>
    %50 = arith.addf %48, %49 : vector<8x32xf32>
    %51 = arith.mulf %44, %27 : vector<8x32xf32>
    %52 = arith.mulf %39, %45 : vector<8x32xf32>
    %53 = arith.addf %51, %52 : vector<8x32xf32>
    %54 = math.tanh %53 : vector<8x32xf32>
    %55 = arith.mulf %50, %54 : vector<8x32xf32>
    %cst_19 = arith.constant dense<0.000000e+00> : vector<8x128xf32>
    %56 = tpu.matmul %27, %30, %cst_19 {dimension_numbers = #tpu.dot_dimension_numbers<[1], [0], [0], [1], [0, 0, 1, 1], [], []>} : vector<8x32xf32>, vector<32x128xf32>, vector<8x128xf32> -> vector<8x128xf32>
    %cst_20 = arith.constant dense<0.000000e+00> : vector<8x128xf32>
    %57 = tpu.matmul %55, %29, %cst_20 {dimension_numbers = #tpu.dot_dimension_numbers<[1], [0], [0], [1], [0, 0, 1, 1], [], []>} : vector<8x32xf32>, vector<32x128xf32>, vector<8x128xf32> -> vector<8x128xf32>
    %58 = arith.addf %56, %57 : vector<8x128xf32>
    %59 = arith.addf %58, %6 : vector<8x128xf32>
    %60 = math.tanh %59 : vector<8x128xf32>
    %61 = vector.extract_strided_slice %60 {offsets = [0, 0], sizes = [8, 32], strides = [1, 1]} : vector<8x128xf32> to vector<8x32xf32>
    %cst_21 = arith.constant 5.000000e-01 : f32
    %62 = vector.broadcast %cst_21 : f32 to vector<8x32xf32>
    %63 = arith.mulf %62, %61 : vector<8x32xf32>
    %cst_22 = arith.constant 5.000000e-01 : f32
    %64 = vector.broadcast %cst_22 : f32 to vector<8x32xf32>
    %65 = arith.addf %63, %64 : vector<8x32xf32>
    %66 = vector.extract_strided_slice %60 {offsets = [0, 32], sizes = [8, 32], strides = [1, 1]} : vector<8x128xf32> to vector<8x32xf32>
    %cst_23 = arith.constant 5.000000e-01 : f32
    %67 = vector.broadcast %cst_23 : f32 to vector<8x32xf32>
    %68 = arith.mulf %67, %66 : vector<8x32xf32>
    %cst_24 = arith.constant 5.000000e-01 : f32
    %69 = vector.broadcast %cst_24 : f32 to vector<8x32xf32>
    %70 = arith.addf %68, %69 : vector<8x32xf32>
    %71 = vector.extract_strided_slice %60 {offsets = [0, 64], sizes = [8, 32], strides = [1, 1]} : vector<8x128xf32> to vector<8x32xf32>
    %72 = vector.extract_strided_slice %60 {offsets = [0, 96], sizes = [8, 32], strides = [1, 1]} : vector<8x128xf32> to vector<8x32xf32>
    %cst_25 = arith.constant 5.000000e-01 : f32
    %73 = vector.broadcast %cst_25 : f32 to vector<8x32xf32>
    %74 = arith.mulf %73, %72 : vector<8x32xf32>
    %cst_26 = arith.constant 5.000000e-01 : f32
    %75 = vector.broadcast %cst_26 : f32 to vector<8x32xf32>
    %76 = arith.addf %74, %75 : vector<8x32xf32>
    %77 = arith.mulf %70, %27 : vector<8x32xf32>
    %78 = arith.mulf %65, %71 : vector<8x32xf32>
    %79 = arith.addf %77, %78 : vector<8x32xf32>
    %80 = math.tanh %79 : vector<8x32xf32>
    %81 = arith.mulf %76, %80 : vector<8x32xf32>
    %cst_27 = arith.constant dense<0.000000e+00> : vector<8x128xf32>
    %82 = tpu.matmul %55, %28, %cst_27 {dimension_numbers = #tpu.dot_dimension_numbers<[1], [0], [0], [1], [0, 0, 1, 1], [], []>} : vector<8x32xf32>, vector<32x128xf32>, vector<8x128xf32> -> vector<8x128xf32>
    %83 = vector.extract_strided_slice %22 {offsets = [8, 0], sizes = [8, 128], strides = [1, 1]} : vector<64x128xf32> to vector<8x128xf32>
    %84 = arith.addf %82, %83 : vector<8x128xf32>
    %85 = math.tanh %84 : vector<8x128xf32>
    %86 = vector.extract_strided_slice %85 {offsets = [0, 0], sizes = [8, 32], strides = [1, 1]} : vector<8x128xf32> to vector<8x32xf32>
    %cst_28 = arith.constant 5.000000e-01 : f32
    %87 = vector.broadcast %cst_28 : f32 to vector<8x32xf32>
    %88 = arith.mulf %87, %86 : vector<8x32xf32>
    %cst_29 = arith.constant 5.000000e-01 : f32
    %89 = vector.broadcast %cst_29 : f32 to vector<8x32xf32>
    %90 = arith.addf %88, %89 : vector<8x32xf32>
    %91 = vector.extract_strided_slice %85 {offsets = [0, 32], sizes = [8, 32], strides = [1, 1]} : vector<8x128xf32> to vector<8x32xf32>
    %cst_30 = arith.constant 5.000000e-01 : f32
    %92 = vector.broadcast %cst_30 : f32 to vector<8x32xf32>
    %93 = arith.mulf %92, %91 : vector<8x32xf32>
    %cst_31 = arith.constant 5.000000e-01 : f32
    %94 = vector.broadcast %cst_31 : f32 to vector<8x32xf32>
    %95 = arith.addf %93, %94 : vector<8x32xf32>
    %96 = vector.extract_strided_slice %85 {offsets = [0, 64], sizes = [8, 32], strides = [1, 1]} : vector<8x128xf32> to vector<8x32xf32>
    %97 = vector.extract_strided_slice %85 {offsets = [0, 96], sizes = [8, 32], strides = [1, 1]} : vector<8x128xf32> to vector<8x32xf32>
    %cst_32 = arith.constant 5.000000e-01 : f32
    %98 = vector.broadcast %cst_32 : f32 to vector<8x32xf32>
    %99 = arith.mulf %98, %97 : vector<8x32xf32>
    %cst_33 = arith.constant 5.000000e-01 : f32
    %100 = vector.broadcast %cst_33 : f32 to vector<8x32xf32>
    %101 = arith.addf %99, %100 : vector<8x32xf32>
    %102 = arith.mulf %95, %53 : vector<8x32xf32>
    %103 = arith.mulf %90, %96 : vector<8x32xf32>
    %104 = arith.addf %102, %103 : vector<8x32xf32>
    %105 = math.tanh %104 : vector<8x32xf32>
    %106 = arith.mulf %101, %105 : vector<8x32xf32>
    %cst_34 = arith.constant dense<0.000000e+00> : vector<8x128xf32>
    %107 = tpu.matmul %81, %30, %cst_34 {dimension_numbers = #tpu.dot_dimension_numbers<[1], [0], [0], [1], [0, 0, 1, 1], [], []>} : vector<8x32xf32>, vector<32x128xf32>, vector<8x128xf32> -> vector<8x128xf32>
    %cst_35 = arith.constant dense<0.000000e+00> : vector<8x128xf32>
    %108 = tpu.matmul %106, %29, %cst_35 {dimension_numbers = #tpu.dot_dimension_numbers<[1], [0], [0], [1], [0, 0, 1, 1], [], []>} : vector<8x32xf32>, vector<32x128xf32>, vector<8x128xf32> -> vector<8x128xf32>
    %109 = arith.addf %107, %108 : vector<8x128xf32>
    %110 = arith.addf %109, %6 : vector<8x128xf32>
    %111 = math.tanh %110 : vector<8x128xf32>
    %112 = vector.extract_strided_slice %111 {offsets = [0, 0], sizes = [8, 32], strides = [1, 1]} : vector<8x128xf32> to vector<8x32xf32>
    %cst_36 = arith.constant 5.000000e-01 : f32
    %113 = vector.broadcast %cst_36 : f32 to vector<8x32xf32>
    %114 = arith.mulf %113, %112 : vector<8x32xf32>
    %cst_37 = arith.constant 5.000000e-01 : f32
    %115 = vector.broadcast %cst_37 : f32 to vector<8x32xf32>
    %116 = arith.addf %114, %115 : vector<8x32xf32>
    %117 = vector.extract_strided_slice %111 {offsets = [0, 32], sizes = [8, 32], strides = [1, 1]} : vector<8x128xf32> to vector<8x32xf32>
    %cst_38 = arith.constant 5.000000e-01 : f32
    %118 = vector.broadcast %cst_38 : f32 to vector<8x32xf32>
    %119 = arith.mulf %118, %117 : vector<8x32xf32>
    %cst_39 = arith.constant 5.000000e-01 : f32
    %120 = vector.broadcast %cst_39 : f32 to vector<8x32xf32>
    %121 = arith.addf %119, %120 : vector<8x32xf32>
    %122 = vector.extract_strided_slice %111 {offsets = [0, 64], sizes = [8, 32], strides = [1, 1]} : vector<8x128xf32> to vector<8x32xf32>
    %123 = vector.extract_strided_slice %111 {offsets = [0, 96], sizes = [8, 32], strides = [1, 1]} : vector<8x128xf32> to vector<8x32xf32>
    %cst_40 = arith.constant 5.000000e-01 : f32
    %124 = vector.broadcast %cst_40 : f32 to vector<8x32xf32>
    %125 = arith.mulf %124, %123 : vector<8x32xf32>
    %cst_41 = arith.constant 5.000000e-01 : f32
    %126 = vector.broadcast %cst_41 : f32 to vector<8x32xf32>
    %127 = arith.addf %125, %126 : vector<8x32xf32>
    %128 = arith.mulf %121, %79 : vector<8x32xf32>
    %129 = arith.mulf %116, %122 : vector<8x32xf32>
    %130 = arith.addf %128, %129 : vector<8x32xf32>
    %131 = math.tanh %130 : vector<8x32xf32>
    %132 = arith.mulf %127, %131 : vector<8x32xf32>
    %cst_42 = arith.constant dense<0.000000e+00> : vector<8x128xf32>
    %133 = tpu.matmul %106, %28, %cst_42 {dimension_numbers = #tpu.dot_dimension_numbers<[1], [0], [0], [1], [0, 0, 1, 1], [], []>} : vector<8x32xf32>, vector<32x128xf32>, vector<8x128xf32> -> vector<8x128xf32>
    %134 = vector.extract_strided_slice %22 {offsets = [16, 0], sizes = [8, 128], strides = [1, 1]} : vector<64x128xf32> to vector<8x128xf32>
    %135 = arith.addf %133, %134 : vector<8x128xf32>
    %136 = math.tanh %135 : vector<8x128xf32>
    %137 = vector.extract_strided_slice %136 {offsets = [0, 0], sizes = [8, 32], strides = [1, 1]} : vector<8x128xf32> to vector<8x32xf32>
    %cst_43 = arith.constant 5.000000e-01 : f32
    %138 = vector.broadcast %cst_43 : f32 to vector<8x32xf32>
    %139 = arith.mulf %138, %137 : vector<8x32xf32>
    %cst_44 = arith.constant 5.000000e-01 : f32
    %140 = vector.broadcast %cst_44 : f32 to vector<8x32xf32>
    %141 = arith.addf %139, %140 : vector<8x32xf32>
    %142 = vector.extract_strided_slice %136 {offsets = [0, 32], sizes = [8, 32], strides = [1, 1]} : vector<8x128xf32> to vector<8x32xf32>
    %cst_45 = arith.constant 5.000000e-01 : f32
    %143 = vector.broadcast %cst_45 : f32 to vector<8x32xf32>
    %144 = arith.mulf %143, %142 : vector<8x32xf32>
    %cst_46 = arith.constant 5.000000e-01 : f32
    %145 = vector.broadcast %cst_46 : f32 to vector<8x32xf32>
    %146 = arith.addf %144, %145 : vector<8x32xf32>
    %147 = vector.extract_strided_slice %136 {offsets = [0, 64], sizes = [8, 32], strides = [1, 1]} : vector<8x128xf32> to vector<8x32xf32>
    %148 = vector.extract_strided_slice %136 {offsets = [0, 96], sizes = [8, 32], strides = [1, 1]} : vector<8x128xf32> to vector<8x32xf32>
    %cst_47 = arith.constant 5.000000e-01 : f32
    %149 = vector.broadcast %cst_47 : f32 to vector<8x32xf32>
    %150 = arith.mulf %149, %148 : vector<8x32xf32>
    %cst_48 = arith.constant 5.000000e-01 : f32
    %151 = vector.broadcast %cst_48 : f32 to vector<8x32xf32>
    %152 = arith.addf %150, %151 : vector<8x32xf32>
    %153 = arith.mulf %146, %104 : vector<8x32xf32>
    %154 = arith.mulf %141, %147 : vector<8x32xf32>
    %155 = arith.addf %153, %154 : vector<8x32xf32>
    %156 = math.tanh %155 : vector<8x32xf32>
    %157 = arith.mulf %152, %156 : vector<8x32xf32>
    %cst_49 = arith.constant dense<0.000000e+00> : vector<8x128xf32>
    %158 = tpu.matmul %132, %30, %cst_49 {dimension_numbers = #tpu.dot_dimension_numbers<[1], [0], [0], [1], [0, 0, 1, 1], [], []>} : vector<8x32xf32>, vector<32x128xf32>, vector<8x128xf32> -> vector<8x128xf32>
    %cst_50 = arith.constant dense<0.000000e+00> : vector<8x128xf32>
    %159 = tpu.matmul %157, %29, %cst_50 {dimension_numbers = #tpu.dot_dimension_numbers<[1], [0], [0], [1], [0, 0, 1, 1], [], []>} : vector<8x32xf32>, vector<32x128xf32>, vector<8x128xf32> -> vector<8x128xf32>
    %160 = arith.addf %158, %159 : vector<8x128xf32>
    %161 = arith.addf %160, %6 : vector<8x128xf32>
    %162 = math.tanh %161 : vector<8x128xf32>
    %163 = vector.extract_strided_slice %162 {offsets = [0, 0], sizes = [8, 32], strides = [1, 1]} : vector<8x128xf32> to vector<8x32xf32>
    %cst_51 = arith.constant 5.000000e-01 : f32
    %164 = vector.broadcast %cst_51 : f32 to vector<8x32xf32>
    %165 = arith.mulf %164, %163 : vector<8x32xf32>
    %cst_52 = arith.constant 5.000000e-01 : f32
    %166 = vector.broadcast %cst_52 : f32 to vector<8x32xf32>
    %167 = arith.addf %165, %166 : vector<8x32xf32>
    %168 = vector.extract_strided_slice %162 {offsets = [0, 32], sizes = [8, 32], strides = [1, 1]} : vector<8x128xf32> to vector<8x32xf32>
    %cst_53 = arith.constant 5.000000e-01 : f32
    %169 = vector.broadcast %cst_53 : f32 to vector<8x32xf32>
    %170 = arith.mulf %169, %168 : vector<8x32xf32>
    %cst_54 = arith.constant 5.000000e-01 : f32
    %171 = vector.broadcast %cst_54 : f32 to vector<8x32xf32>
    %172 = arith.addf %170, %171 : vector<8x32xf32>
    %173 = vector.extract_strided_slice %162 {offsets = [0, 64], sizes = [8, 32], strides = [1, 1]} : vector<8x128xf32> to vector<8x32xf32>
    %174 = vector.extract_strided_slice %162 {offsets = [0, 96], sizes = [8, 32], strides = [1, 1]} : vector<8x128xf32> to vector<8x32xf32>
    %cst_55 = arith.constant 5.000000e-01 : f32
    %175 = vector.broadcast %cst_55 : f32 to vector<8x32xf32>
    %176 = arith.mulf %175, %174 : vector<8x32xf32>
    %cst_56 = arith.constant 5.000000e-01 : f32
    %177 = vector.broadcast %cst_56 : f32 to vector<8x32xf32>
    %178 = arith.addf %176, %177 : vector<8x32xf32>
    %179 = arith.mulf %172, %130 : vector<8x32xf32>
    %180 = arith.mulf %167, %173 : vector<8x32xf32>
    %181 = arith.addf %179, %180 : vector<8x32xf32>
    %182 = math.tanh %181 : vector<8x32xf32>
    %183 = arith.mulf %178, %182 : vector<8x32xf32>
    %cst_57 = arith.constant dense<0.000000e+00> : vector<8x128xf32>
    %184 = tpu.matmul %157, %28, %cst_57 {dimension_numbers = #tpu.dot_dimension_numbers<[1], [0], [0], [1], [0, 0, 1, 1], [], []>} : vector<8x32xf32>, vector<32x128xf32>, vector<8x128xf32> -> vector<8x128xf32>
    %185 = vector.extract_strided_slice %22 {offsets = [24, 0], sizes = [8, 128], strides = [1, 1]} : vector<64x128xf32> to vector<8x128xf32>
    %186 = arith.addf %184, %185 : vector<8x128xf32>
    %187 = math.tanh %186 : vector<8x128xf32>
    %188 = vector.extract_strided_slice %187 {offsets = [0, 0], sizes = [8, 32], strides = [1, 1]} : vector<8x128xf32> to vector<8x32xf32>
    %cst_58 = arith.constant 5.000000e-01 : f32
    %189 = vector.broadcast %cst_58 : f32 to vector<8x32xf32>
    %190 = arith.mulf %189, %188 : vector<8x32xf32>
    %cst_59 = arith.constant 5.000000e-01 : f32
    %191 = vector.broadcast %cst_59 : f32 to vector<8x32xf32>
    %192 = arith.addf %190, %191 : vector<8x32xf32>
    %193 = vector.extract_strided_slice %187 {offsets = [0, 32], sizes = [8, 32], strides = [1, 1]} : vector<8x128xf32> to vector<8x32xf32>
    %cst_60 = arith.constant 5.000000e-01 : f32
    %194 = vector.broadcast %cst_60 : f32 to vector<8x32xf32>
    %195 = arith.mulf %194, %193 : vector<8x32xf32>
    %cst_61 = arith.constant 5.000000e-01 : f32
    %196 = vector.broadcast %cst_61 : f32 to vector<8x32xf32>
    %197 = arith.addf %195, %196 : vector<8x32xf32>
    %198 = vector.extract_strided_slice %187 {offsets = [0, 64], sizes = [8, 32], strides = [1, 1]} : vector<8x128xf32> to vector<8x32xf32>
    %199 = vector.extract_strided_slice %187 {offsets = [0, 96], sizes = [8, 32], strides = [1, 1]} : vector<8x128xf32> to vector<8x32xf32>
    %cst_62 = arith.constant 5.000000e-01 : f32
    %200 = vector.broadcast %cst_62 : f32 to vector<8x32xf32>
    %201 = arith.mulf %200, %199 : vector<8x32xf32>
    %cst_63 = arith.constant 5.000000e-01 : f32
    %202 = vector.broadcast %cst_63 : f32 to vector<8x32xf32>
    %203 = arith.addf %201, %202 : vector<8x32xf32>
    %204 = arith.mulf %197, %155 : vector<8x32xf32>
    %205 = arith.mulf %192, %198 : vector<8x32xf32>
    %206 = arith.addf %204, %205 : vector<8x32xf32>
    %207 = math.tanh %206 : vector<8x32xf32>
    %208 = arith.mulf %203, %207 : vector<8x32xf32>
    %cst_64 = arith.constant dense<0.000000e+00> : vector<8x128xf32>
    %209 = tpu.matmul %183, %30, %cst_64 {dimension_numbers = #tpu.dot_dimension_numbers<[1], [0], [0], [1], [0, 0, 1, 1], [], []>} : vector<8x32xf32>, vector<32x128xf32>, vector<8x128xf32> -> vector<8x128xf32>
    %cst_65 = arith.constant dense<0.000000e+00> : vector<8x128xf32>
    %210 = tpu.matmul %208, %29, %cst_65 {dimension_numbers = #tpu.dot_dimension_numbers<[1], [0], [0], [1], [0, 0, 1, 1], [], []>} : vector<8x32xf32>, vector<32x128xf32>, vector<8x128xf32> -> vector<8x128xf32>
    %211 = arith.addf %209, %210 : vector<8x128xf32>
    %212 = arith.addf %211, %6 : vector<8x128xf32>
    %213 = math.tanh %212 : vector<8x128xf32>
    %214 = vector.extract_strided_slice %213 {offsets = [0, 0], sizes = [8, 32], strides = [1, 1]} : vector<8x128xf32> to vector<8x32xf32>
    %cst_66 = arith.constant 5.000000e-01 : f32
    %215 = vector.broadcast %cst_66 : f32 to vector<8x32xf32>
    %216 = arith.mulf %215, %214 : vector<8x32xf32>
    %cst_67 = arith.constant 5.000000e-01 : f32
    %217 = vector.broadcast %cst_67 : f32 to vector<8x32xf32>
    %218 = arith.addf %216, %217 : vector<8x32xf32>
    %219 = vector.extract_strided_slice %213 {offsets = [0, 32], sizes = [8, 32], strides = [1, 1]} : vector<8x128xf32> to vector<8x32xf32>
    %cst_68 = arith.constant 5.000000e-01 : f32
    %220 = vector.broadcast %cst_68 : f32 to vector<8x32xf32>
    %221 = arith.mulf %220, %219 : vector<8x32xf32>
    %cst_69 = arith.constant 5.000000e-01 : f32
    %222 = vector.broadcast %cst_69 : f32 to vector<8x32xf32>
    %223 = arith.addf %221, %222 : vector<8x32xf32>
    %224 = vector.extract_strided_slice %213 {offsets = [0, 64], sizes = [8, 32], strides = [1, 1]} : vector<8x128xf32> to vector<8x32xf32>
    %225 = vector.extract_strided_slice %213 {offsets = [0, 96], sizes = [8, 32], strides = [1, 1]} : vector<8x128xf32> to vector<8x32xf32>
    %cst_70 = arith.constant 5.000000e-01 : f32
    %226 = vector.broadcast %cst_70 : f32 to vector<8x32xf32>
    %227 = arith.mulf %226, %225 : vector<8x32xf32>
    %cst_71 = arith.constant 5.000000e-01 : f32
    %228 = vector.broadcast %cst_71 : f32 to vector<8x32xf32>
    %229 = arith.addf %227, %228 : vector<8x32xf32>
    %230 = arith.mulf %223, %181 : vector<8x32xf32>
    %231 = arith.mulf %218, %224 : vector<8x32xf32>
    %232 = arith.addf %230, %231 : vector<8x32xf32>
    %233 = math.tanh %232 : vector<8x32xf32>
    %234 = arith.mulf %229, %233 : vector<8x32xf32>
    %cst_72 = arith.constant dense<0.000000e+00> : vector<8x128xf32>
    %235 = tpu.matmul %208, %28, %cst_72 {dimension_numbers = #tpu.dot_dimension_numbers<[1], [0], [0], [1], [0, 0, 1, 1], [], []>} : vector<8x32xf32>, vector<32x128xf32>, vector<8x128xf32> -> vector<8x128xf32>
    %236 = vector.extract_strided_slice %22 {offsets = [32, 0], sizes = [8, 128], strides = [1, 1]} : vector<64x128xf32> to vector<8x128xf32>
    %237 = arith.addf %235, %236 : vector<8x128xf32>
    %238 = math.tanh %237 : vector<8x128xf32>
    %239 = vector.extract_strided_slice %238 {offsets = [0, 0], sizes = [8, 32], strides = [1, 1]} : vector<8x128xf32> to vector<8x32xf32>
    %cst_73 = arith.constant 5.000000e-01 : f32
    %240 = vector.broadcast %cst_73 : f32 to vector<8x32xf32>
    %241 = arith.mulf %240, %239 : vector<8x32xf32>
    %cst_74 = arith.constant 5.000000e-01 : f32
    %242 = vector.broadcast %cst_74 : f32 to vector<8x32xf32>
    %243 = arith.addf %241, %242 : vector<8x32xf32>
    %244 = vector.extract_strided_slice %238 {offsets = [0, 32], sizes = [8, 32], strides = [1, 1]} : vector<8x128xf32> to vector<8x32xf32>
    %cst_75 = arith.constant 5.000000e-01 : f32
    %245 = vector.broadcast %cst_75 : f32 to vector<8x32xf32>
    %246 = arith.mulf %245, %244 : vector<8x32xf32>
    %cst_76 = arith.constant 5.000000e-01 : f32
    %247 = vector.broadcast %cst_76 : f32 to vector<8x32xf32>
    %248 = arith.addf %246, %247 : vector<8x32xf32>
    %249 = vector.extract_strided_slice %238 {offsets = [0, 64], sizes = [8, 32], strides = [1, 1]} : vector<8x128xf32> to vector<8x32xf32>
    %250 = vector.extract_strided_slice %238 {offsets = [0, 96], sizes = [8, 32], strides = [1, 1]} : vector<8x128xf32> to vector<8x32xf32>
    %cst_77 = arith.constant 5.000000e-01 : f32
    %251 = vector.broadcast %cst_77 : f32 to vector<8x32xf32>
    %252 = arith.mulf %251, %250 : vector<8x32xf32>
    %cst_78 = arith.constant 5.000000e-01 : f32
    %253 = vector.broadcast %cst_78 : f32 to vector<8x32xf32>
    %254 = arith.addf %252, %253 : vector<8x32xf32>
    %255 = arith.mulf %248, %206 : vector<8x32xf32>
    %256 = arith.mulf %243, %249 : vector<8x32xf32>
    %257 = arith.addf %255, %256 : vector<8x32xf32>
    %258 = math.tanh %257 : vector<8x32xf32>
    %259 = arith.mulf %254, %258 : vector<8x32xf32>
    %cst_79 = arith.constant dense<0.000000e+00> : vector<8x128xf32>
    %260 = tpu.matmul %234, %30, %cst_79 {dimension_numbers = #tpu.dot_dimension_numbers<[1], [0], [0], [1], [0, 0, 1, 1], [], []>} : vector<8x32xf32>, vector<32x128xf32>, vector<8x128xf32> -> vector<8x128xf32>
    %cst_80 = arith.constant dense<0.000000e+00> : vector<8x128xf32>
    %261 = tpu.matmul %259, %29, %cst_80 {dimension_numbers = #tpu.dot_dimension_numbers<[1], [0], [0], [1], [0, 0, 1, 1], [], []>} : vector<8x32xf32>, vector<32x128xf32>, vector<8x128xf32> -> vector<8x128xf32>
    %262 = arith.addf %260, %261 : vector<8x128xf32>
    %263 = arith.addf %262, %6 : vector<8x128xf32>
    %264 = math.tanh %263 : vector<8x128xf32>
    %265 = vector.extract_strided_slice %264 {offsets = [0, 0], sizes = [8, 32], strides = [1, 1]} : vector<8x128xf32> to vector<8x32xf32>
    %cst_81 = arith.constant 5.000000e-01 : f32
    %266 = vector.broadcast %cst_81 : f32 to vector<8x32xf32>
    %267 = arith.mulf %266, %265 : vector<8x32xf32>
    %cst_82 = arith.constant 5.000000e-01 : f32
    %268 = vector.broadcast %cst_82 : f32 to vector<8x32xf32>
    %269 = arith.addf %267, %268 : vector<8x32xf32>
    %270 = vector.extract_strided_slice %264 {offsets = [0, 32], sizes = [8, 32], strides = [1, 1]} : vector<8x128xf32> to vector<8x32xf32>
    %cst_83 = arith.constant 5.000000e-01 : f32
    %271 = vector.broadcast %cst_83 : f32 to vector<8x32xf32>
    %272 = arith.mulf %271, %270 : vector<8x32xf32>
    %cst_84 = arith.constant 5.000000e-01 : f32
    %273 = vector.broadcast %cst_84 : f32 to vector<8x32xf32>
    %274 = arith.addf %272, %273 : vector<8x32xf32>
    %275 = vector.extract_strided_slice %264 {offsets = [0, 64], sizes = [8, 32], strides = [1, 1]} : vector<8x128xf32> to vector<8x32xf32>
    %276 = vector.extract_strided_slice %264 {offsets = [0, 96], sizes = [8, 32], strides = [1, 1]} : vector<8x128xf32> to vector<8x32xf32>
    %cst_85 = arith.constant 5.000000e-01 : f32
    %277 = vector.broadcast %cst_85 : f32 to vector<8x32xf32>
    %278 = arith.mulf %277, %276 : vector<8x32xf32>
    %cst_86 = arith.constant 5.000000e-01 : f32
    %279 = vector.broadcast %cst_86 : f32 to vector<8x32xf32>
    %280 = arith.addf %278, %279 : vector<8x32xf32>
    %281 = arith.mulf %274, %232 : vector<8x32xf32>
    %282 = arith.mulf %269, %275 : vector<8x32xf32>
    %283 = arith.addf %281, %282 : vector<8x32xf32>
    %284 = math.tanh %283 : vector<8x32xf32>
    %285 = arith.mulf %280, %284 : vector<8x32xf32>
    %cst_87 = arith.constant dense<0.000000e+00> : vector<8x128xf32>
    %286 = tpu.matmul %259, %28, %cst_87 {dimension_numbers = #tpu.dot_dimension_numbers<[1], [0], [0], [1], [0, 0, 1, 1], [], []>} : vector<8x32xf32>, vector<32x128xf32>, vector<8x128xf32> -> vector<8x128xf32>
    %287 = vector.extract_strided_slice %22 {offsets = [40, 0], sizes = [8, 128], strides = [1, 1]} : vector<64x128xf32> to vector<8x128xf32>
    %288 = arith.addf %286, %287 : vector<8x128xf32>
    %289 = math.tanh %288 : vector<8x128xf32>
    %290 = vector.extract_strided_slice %289 {offsets = [0, 0], sizes = [8, 32], strides = [1, 1]} : vector<8x128xf32> to vector<8x32xf32>
    %cst_88 = arith.constant 5.000000e-01 : f32
    %291 = vector.broadcast %cst_88 : f32 to vector<8x32xf32>
    %292 = arith.mulf %291, %290 : vector<8x32xf32>
    %cst_89 = arith.constant 5.000000e-01 : f32
    %293 = vector.broadcast %cst_89 : f32 to vector<8x32xf32>
    %294 = arith.addf %292, %293 : vector<8x32xf32>
    %295 = vector.extract_strided_slice %289 {offsets = [0, 32], sizes = [8, 32], strides = [1, 1]} : vector<8x128xf32> to vector<8x32xf32>
    %cst_90 = arith.constant 5.000000e-01 : f32
    %296 = vector.broadcast %cst_90 : f32 to vector<8x32xf32>
    %297 = arith.mulf %296, %295 : vector<8x32xf32>
    %cst_91 = arith.constant 5.000000e-01 : f32
    %298 = vector.broadcast %cst_91 : f32 to vector<8x32xf32>
    %299 = arith.addf %297, %298 : vector<8x32xf32>
    %300 = vector.extract_strided_slice %289 {offsets = [0, 64], sizes = [8, 32], strides = [1, 1]} : vector<8x128xf32> to vector<8x32xf32>
    %301 = vector.extract_strided_slice %289 {offsets = [0, 96], sizes = [8, 32], strides = [1, 1]} : vector<8x128xf32> to vector<8x32xf32>
    %cst_92 = arith.constant 5.000000e-01 : f32
    %302 = vector.broadcast %cst_92 : f32 to vector<8x32xf32>
    %303 = arith.mulf %302, %301 : vector<8x32xf32>
    %cst_93 = arith.constant 5.000000e-01 : f32
    %304 = vector.broadcast %cst_93 : f32 to vector<8x32xf32>
    %305 = arith.addf %303, %304 : vector<8x32xf32>
    %306 = arith.mulf %299, %257 : vector<8x32xf32>
    %307 = arith.mulf %294, %300 : vector<8x32xf32>
    %308 = arith.addf %306, %307 : vector<8x32xf32>
    %309 = math.tanh %308 : vector<8x32xf32>
    %310 = arith.mulf %305, %309 : vector<8x32xf32>
    %cst_94 = arith.constant dense<0.000000e+00> : vector<8x128xf32>
    %311 = tpu.matmul %285, %30, %cst_94 {dimension_numbers = #tpu.dot_dimension_numbers<[1], [0], [0], [1], [0, 0, 1, 1], [], []>} : vector<8x32xf32>, vector<32x128xf32>, vector<8x128xf32> -> vector<8x128xf32>
    %cst_95 = arith.constant dense<0.000000e+00> : vector<8x128xf32>
    %312 = tpu.matmul %310, %29, %cst_95 {dimension_numbers = #tpu.dot_dimension_numbers<[1], [0], [0], [1], [0, 0, 1, 1], [], []>} : vector<8x32xf32>, vector<32x128xf32>, vector<8x128xf32> -> vector<8x128xf32>
    %313 = arith.addf %311, %312 : vector<8x128xf32>
    %314 = arith.addf %313, %6 : vector<8x128xf32>
    %315 = math.tanh %314 : vector<8x128xf32>
    %316 = vector.extract_strided_slice %315 {offsets = [0, 0], sizes = [8, 32], strides = [1, 1]} : vector<8x128xf32> to vector<8x32xf32>
    %cst_96 = arith.constant 5.000000e-01 : f32
    %317 = vector.broadcast %cst_96 : f32 to vector<8x32xf32>
    %318 = arith.mulf %317, %316 : vector<8x32xf32>
    %cst_97 = arith.constant 5.000000e-01 : f32
    %319 = vector.broadcast %cst_97 : f32 to vector<8x32xf32>
    %320 = arith.addf %318, %319 : vector<8x32xf32>
    %321 = vector.extract_strided_slice %315 {offsets = [0, 32], sizes = [8, 32], strides = [1, 1]} : vector<8x128xf32> to vector<8x32xf32>
    %cst_98 = arith.constant 5.000000e-01 : f32
    %322 = vector.broadcast %cst_98 : f32 to vector<8x32xf32>
    %323 = arith.mulf %322, %321 : vector<8x32xf32>
    %cst_99 = arith.constant 5.000000e-01 : f32
    %324 = vector.broadcast %cst_99 : f32 to vector<8x32xf32>
    %325 = arith.addf %323, %324 : vector<8x32xf32>
    %326 = vector.extract_strided_slice %315 {offsets = [0, 64], sizes = [8, 32], strides = [1, 1]} : vector<8x128xf32> to vector<8x32xf32>
    %327 = vector.extract_strided_slice %315 {offsets = [0, 96], sizes = [8, 32], strides = [1, 1]} : vector<8x128xf32> to vector<8x32xf32>
    %cst_100 = arith.constant 5.000000e-01 : f32
    %328 = vector.broadcast %cst_100 : f32 to vector<8x32xf32>
    %329 = arith.mulf %328, %327 : vector<8x32xf32>
    %cst_101 = arith.constant 5.000000e-01 : f32
    %330 = vector.broadcast %cst_101 : f32 to vector<8x32xf32>
    %331 = arith.addf %329, %330 : vector<8x32xf32>
    %332 = arith.mulf %325, %283 : vector<8x32xf32>
    %333 = arith.mulf %320, %326 : vector<8x32xf32>
    %334 = arith.addf %332, %333 : vector<8x32xf32>
    %335 = math.tanh %334 : vector<8x32xf32>
    %336 = arith.mulf %331, %335 : vector<8x32xf32>
    %cst_102 = arith.constant dense<0.000000e+00> : vector<8x128xf32>
    %337 = tpu.matmul %310, %28, %cst_102 {dimension_numbers = #tpu.dot_dimension_numbers<[1], [0], [0], [1], [0, 0, 1, 1], [], []>} : vector<8x32xf32>, vector<32x128xf32>, vector<8x128xf32> -> vector<8x128xf32>
    %338 = vector.extract_strided_slice %22 {offsets = [48, 0], sizes = [8, 128], strides = [1, 1]} : vector<64x128xf32> to vector<8x128xf32>
    %339 = arith.addf %337, %338 : vector<8x128xf32>
    %340 = math.tanh %339 : vector<8x128xf32>
    %341 = vector.extract_strided_slice %340 {offsets = [0, 0], sizes = [8, 32], strides = [1, 1]} : vector<8x128xf32> to vector<8x32xf32>
    %cst_103 = arith.constant 5.000000e-01 : f32
    %342 = vector.broadcast %cst_103 : f32 to vector<8x32xf32>
    %343 = arith.mulf %342, %341 : vector<8x32xf32>
    %cst_104 = arith.constant 5.000000e-01 : f32
    %344 = vector.broadcast %cst_104 : f32 to vector<8x32xf32>
    %345 = arith.addf %343, %344 : vector<8x32xf32>
    %346 = vector.extract_strided_slice %340 {offsets = [0, 32], sizes = [8, 32], strides = [1, 1]} : vector<8x128xf32> to vector<8x32xf32>
    %cst_105 = arith.constant 5.000000e-01 : f32
    %347 = vector.broadcast %cst_105 : f32 to vector<8x32xf32>
    %348 = arith.mulf %347, %346 : vector<8x32xf32>
    %cst_106 = arith.constant 5.000000e-01 : f32
    %349 = vector.broadcast %cst_106 : f32 to vector<8x32xf32>
    %350 = arith.addf %348, %349 : vector<8x32xf32>
    %351 = vector.extract_strided_slice %340 {offsets = [0, 64], sizes = [8, 32], strides = [1, 1]} : vector<8x128xf32> to vector<8x32xf32>
    %352 = vector.extract_strided_slice %340 {offsets = [0, 96], sizes = [8, 32], strides = [1, 1]} : vector<8x128xf32> to vector<8x32xf32>
    %cst_107 = arith.constant 5.000000e-01 : f32
    %353 = vector.broadcast %cst_107 : f32 to vector<8x32xf32>
    %354 = arith.mulf %353, %352 : vector<8x32xf32>
    %cst_108 = arith.constant 5.000000e-01 : f32
    %355 = vector.broadcast %cst_108 : f32 to vector<8x32xf32>
    %356 = arith.addf %354, %355 : vector<8x32xf32>
    %357 = arith.mulf %350, %308 : vector<8x32xf32>
    %358 = arith.mulf %345, %351 : vector<8x32xf32>
    %359 = arith.addf %357, %358 : vector<8x32xf32>
    %360 = math.tanh %359 : vector<8x32xf32>
    %361 = arith.mulf %356, %360 : vector<8x32xf32>
    %cst_109 = arith.constant dense<0.000000e+00> : vector<8x128xf32>
    %362 = tpu.matmul %336, %30, %cst_109 {dimension_numbers = #tpu.dot_dimension_numbers<[1], [0], [0], [1], [0, 0, 1, 1], [], []>} : vector<8x32xf32>, vector<32x128xf32>, vector<8x128xf32> -> vector<8x128xf32>
    %cst_110 = arith.constant dense<0.000000e+00> : vector<8x128xf32>
    %363 = tpu.matmul %361, %29, %cst_110 {dimension_numbers = #tpu.dot_dimension_numbers<[1], [0], [0], [1], [0, 0, 1, 1], [], []>} : vector<8x32xf32>, vector<32x128xf32>, vector<8x128xf32> -> vector<8x128xf32>
    %364 = arith.addf %362, %363 : vector<8x128xf32>
    %365 = arith.addf %364, %6 : vector<8x128xf32>
    %366 = math.tanh %365 : vector<8x128xf32>
    %367 = vector.extract_strided_slice %366 {offsets = [0, 0], sizes = [8, 32], strides = [1, 1]} : vector<8x128xf32> to vector<8x32xf32>
    %cst_111 = arith.constant 5.000000e-01 : f32
    %368 = vector.broadcast %cst_111 : f32 to vector<8x32xf32>
    %369 = arith.mulf %368, %367 : vector<8x32xf32>
    %cst_112 = arith.constant 5.000000e-01 : f32
    %370 = vector.broadcast %cst_112 : f32 to vector<8x32xf32>
    %371 = arith.addf %369, %370 : vector<8x32xf32>
    %372 = vector.extract_strided_slice %366 {offsets = [0, 32], sizes = [8, 32], strides = [1, 1]} : vector<8x128xf32> to vector<8x32xf32>
    %cst_113 = arith.constant 5.000000e-01 : f32
    %373 = vector.broadcast %cst_113 : f32 to vector<8x32xf32>
    %374 = arith.mulf %373, %372 : vector<8x32xf32>
    %cst_114 = arith.constant 5.000000e-01 : f32
    %375 = vector.broadcast %cst_114 : f32 to vector<8x32xf32>
    %376 = arith.addf %374, %375 : vector<8x32xf32>
    %377 = vector.extract_strided_slice %366 {offsets = [0, 64], sizes = [8, 32], strides = [1, 1]} : vector<8x128xf32> to vector<8x32xf32>
    %378 = vector.extract_strided_slice %366 {offsets = [0, 96], sizes = [8, 32], strides = [1, 1]} : vector<8x128xf32> to vector<8x32xf32>
    %cst_115 = arith.constant 5.000000e-01 : f32
    %379 = vector.broadcast %cst_115 : f32 to vector<8x32xf32>
    %380 = arith.mulf %379, %378 : vector<8x32xf32>
    %cst_116 = arith.constant 5.000000e-01 : f32
    %381 = vector.broadcast %cst_116 : f32 to vector<8x32xf32>
    %382 = arith.addf %380, %381 : vector<8x32xf32>
    %383 = arith.mulf %376, %334 : vector<8x32xf32>
    %384 = arith.mulf %371, %377 : vector<8x32xf32>
    %385 = arith.addf %383, %384 : vector<8x32xf32>
    %386 = math.tanh %385 : vector<8x32xf32>
    %387 = arith.mulf %382, %386 : vector<8x32xf32>
    %cst_117 = arith.constant dense<0.000000e+00> : vector<8x128xf32>
    %388 = tpu.matmul %361, %28, %cst_117 {dimension_numbers = #tpu.dot_dimension_numbers<[1], [0], [0], [1], [0, 0, 1, 1], [], []>} : vector<8x32xf32>, vector<32x128xf32>, vector<8x128xf32> -> vector<8x128xf32>
    %389 = vector.extract_strided_slice %22 {offsets = [56, 0], sizes = [8, 128], strides = [1, 1]} : vector<64x128xf32> to vector<8x128xf32>
    %390 = arith.addf %388, %389 : vector<8x128xf32>
    %391 = math.tanh %390 : vector<8x128xf32>
    %392 = vector.extract_strided_slice %391 {offsets = [0, 0], sizes = [8, 32], strides = [1, 1]} : vector<8x128xf32> to vector<8x32xf32>
    %cst_118 = arith.constant 5.000000e-01 : f32
    %393 = vector.broadcast %cst_118 : f32 to vector<8x32xf32>
    %394 = arith.mulf %393, %392 : vector<8x32xf32>
    %cst_119 = arith.constant 5.000000e-01 : f32
    %395 = vector.broadcast %cst_119 : f32 to vector<8x32xf32>
    %396 = arith.addf %394, %395 : vector<8x32xf32>
    %397 = vector.extract_strided_slice %391 {offsets = [0, 32], sizes = [8, 32], strides = [1, 1]} : vector<8x128xf32> to vector<8x32xf32>
    %cst_120 = arith.constant 5.000000e-01 : f32
    %398 = vector.broadcast %cst_120 : f32 to vector<8x32xf32>
    %399 = arith.mulf %398, %397 : vector<8x32xf32>
    %cst_121 = arith.constant 5.000000e-01 : f32
    %400 = vector.broadcast %cst_121 : f32 to vector<8x32xf32>
    %401 = arith.addf %399, %400 : vector<8x32xf32>
    %402 = vector.extract_strided_slice %391 {offsets = [0, 64], sizes = [8, 32], strides = [1, 1]} : vector<8x128xf32> to vector<8x32xf32>
    %403 = vector.extract_strided_slice %391 {offsets = [0, 96], sizes = [8, 32], strides = [1, 1]} : vector<8x128xf32> to vector<8x32xf32>
    %cst_122 = arith.constant 5.000000e-01 : f32
    %404 = vector.broadcast %cst_122 : f32 to vector<8x32xf32>
    %405 = arith.mulf %404, %403 : vector<8x32xf32>
    %cst_123 = arith.constant 5.000000e-01 : f32
    %406 = vector.broadcast %cst_123 : f32 to vector<8x32xf32>
    %407 = arith.addf %405, %406 : vector<8x32xf32>
    %408 = arith.mulf %401, %359 : vector<8x32xf32>
    %409 = arith.mulf %396, %402 : vector<8x32xf32>
    %410 = arith.addf %408, %409 : vector<8x32xf32>
    %411 = math.tanh %410 : vector<8x32xf32>
    %412 = arith.mulf %407, %411 : vector<8x32xf32>
    %cst_124 = arith.constant dense<0.000000e+00> : vector<8x128xf32>
    %413 = tpu.matmul %387, %30, %cst_124 {dimension_numbers = #tpu.dot_dimension_numbers<[1], [0], [0], [1], [0, 0, 1, 1], [], []>} : vector<8x32xf32>, vector<32x128xf32>, vector<8x128xf32> -> vector<8x128xf32>
    %cst_125 = arith.constant dense<0.000000e+00> : vector<8x128xf32>
    %414 = tpu.matmul %412, %29, %cst_125 {dimension_numbers = #tpu.dot_dimension_numbers<[1], [0], [0], [1], [0, 0, 1, 1], [], []>} : vector<8x32xf32>, vector<32x128xf32>, vector<8x128xf32> -> vector<8x128xf32>
    %415 = arith.addf %413, %414 : vector<8x128xf32>
    %416 = arith.addf %415, %6 : vector<8x128xf32>
    %417 = math.tanh %416 : vector<8x128xf32>
    %418 = vector.extract_strided_slice %417 {offsets = [0, 0], sizes = [8, 32], strides = [1, 1]} : vector<8x128xf32> to vector<8x32xf32>
    %cst_126 = arith.constant 5.000000e-01 : f32
    %419 = vector.broadcast %cst_126 : f32 to vector<8x32xf32>
    %420 = arith.mulf %419, %418 : vector<8x32xf32>
    %cst_127 = arith.constant 5.000000e-01 : f32
    %421 = vector.broadcast %cst_127 : f32 to vector<8x32xf32>
    %422 = arith.addf %420, %421 : vector<8x32xf32>
    %423 = vector.extract_strided_slice %417 {offsets = [0, 32], sizes = [8, 32], strides = [1, 1]} : vector<8x128xf32> to vector<8x32xf32>
    %cst_128 = arith.constant 5.000000e-01 : f32
    %424 = vector.broadcast %cst_128 : f32 to vector<8x32xf32>
    %425 = arith.mulf %424, %423 : vector<8x32xf32>
    %cst_129 = arith.constant 5.000000e-01 : f32
    %426 = vector.broadcast %cst_129 : f32 to vector<8x32xf32>
    %427 = arith.addf %425, %426 : vector<8x32xf32>
    %428 = vector.extract_strided_slice %417 {offsets = [0, 64], sizes = [8, 32], strides = [1, 1]} : vector<8x128xf32> to vector<8x32xf32>
    %429 = vector.extract_strided_slice %417 {offsets = [0, 96], sizes = [8, 32], strides = [1, 1]} : vector<8x128xf32> to vector<8x32xf32>
    %cst_130 = arith.constant 5.000000e-01 : f32
    %430 = vector.broadcast %cst_130 : f32 to vector<8x32xf32>
    %431 = arith.mulf %430, %429 : vector<8x32xf32>
    %cst_131 = arith.constant 5.000000e-01 : f32
    %432 = vector.broadcast %cst_131 : f32 to vector<8x32xf32>
    %433 = arith.addf %431, %432 : vector<8x32xf32>
    %434 = arith.mulf %427, %385 : vector<8x32xf32>
    %435 = arith.mulf %422, %428 : vector<8x32xf32>
    %436 = arith.addf %434, %435 : vector<8x32xf32>
    %437 = math.tanh %436 : vector<8x32xf32>
    %438 = arith.mulf %433, %437 : vector<8x32xf32>
    %c112 = arith.constant 112 : index
    %c0_132 = arith.constant 0 : index
    %439 = vector.load %arg1[%c112, %c0_132] : memref<272x128xf32, #tpu.memory_space<vmem>>, vector<32x128xf32>
    %c144 = arith.constant 144 : index
    %c0_133 = arith.constant 0 : index
    %440 = vector.load %arg1[%c144, %c0_133] : memref<272x128xf32, #tpu.memory_space<vmem>>, vector<32x128xf32>
    %c176 = arith.constant 176 : index
    %c0_134 = arith.constant 0 : index
    %441 = vector.load %arg1[%c176, %c0_134] : memref<272x128xf32, #tpu.memory_space<vmem>>, vector<32x128xf32>
    %c208 = arith.constant 208 : index
    %c0_135 = arith.constant 0 : index
    %442 = vector.load %arg1[%c208, %c0_135] : memref<272x128xf32, #tpu.memory_space<vmem>>, vector<32x128xf32>
    %cst_136 = arith.constant dense<0.000000e+00> : vector<8x128xf32>
    %443 = tpu.matmul %412, %439, %cst_136 {dimension_numbers = #tpu.dot_dimension_numbers<[1], [0], [0], [1], [0, 0, 1, 1], [], []>} : vector<8x32xf32>, vector<32x128xf32>, vector<8x128xf32> -> vector<8x128xf32>
    %444 = arith.addf %443, %26 : vector<8x128xf32>
    %445 = math.tanh %444 : vector<8x128xf32>
    %446 = vector.extract_strided_slice %445 {offsets = [0, 0], sizes = [8, 32], strides = [1, 1]} : vector<8x128xf32> to vector<8x32xf32>
    %cst_137 = arith.constant 5.000000e-01 : f32
    %447 = vector.broadcast %cst_137 : f32 to vector<8x32xf32>
    %448 = arith.mulf %447, %446 : vector<8x32xf32>
    %cst_138 = arith.constant 5.000000e-01 : f32
    %449 = vector.broadcast %cst_138 : f32 to vector<8x32xf32>
    %450 = arith.addf %448, %449 : vector<8x32xf32>
    %451 = vector.extract_strided_slice %445 {offsets = [0, 32], sizes = [8, 32], strides = [1, 1]} : vector<8x128xf32> to vector<8x32xf32>
    %cst_139 = arith.constant 5.000000e-01 : f32
    %452 = vector.broadcast %cst_139 : f32 to vector<8x32xf32>
    %453 = arith.mulf %452, %451 : vector<8x32xf32>
    %cst_140 = arith.constant 5.000000e-01 : f32
    %454 = vector.broadcast %cst_140 : f32 to vector<8x32xf32>
    %455 = arith.addf %453, %454 : vector<8x32xf32>
    %456 = vector.extract_strided_slice %445 {offsets = [0, 64], sizes = [8, 32], strides = [1, 1]} : vector<8x128xf32> to vector<8x32xf32>
    %457 = vector.extract_strided_slice %445 {offsets = [0, 96], sizes = [8, 32], strides = [1, 1]} : vector<8x128xf32> to vector<8x32xf32>
    %cst_141 = arith.constant 5.000000e-01 : f32
    %458 = vector.broadcast %cst_141 : f32 to vector<8x32xf32>
    %459 = arith.mulf %458, %457 : vector<8x32xf32>
    %cst_142 = arith.constant 5.000000e-01 : f32
    %460 = vector.broadcast %cst_142 : f32 to vector<8x32xf32>
    %461 = arith.addf %459, %460 : vector<8x32xf32>
    %462 = arith.mulf %455, %410 : vector<8x32xf32>
    %463 = arith.mulf %450, %456 : vector<8x32xf32>
    %464 = arith.addf %462, %463 : vector<8x32xf32>
    %465 = math.tanh %464 : vector<8x32xf32>
    %466 = arith.mulf %461, %465 : vector<8x32xf32>
    %cst_143 = arith.constant dense<0.000000e+00> : vector<8x128xf32>
    %467 = tpu.matmul %438, %441, %cst_143 {dimension_numbers = #tpu.dot_dimension_numbers<[1], [0], [0], [1], [0, 0, 1, 1], [], []>} : vector<8x32xf32>, vector<32x128xf32>, vector<8x128xf32> -> vector<8x128xf32>
    %cst_144 = arith.constant dense<0.000000e+00> : vector<8x128xf32>
    %468 = tpu.matmul %466, %440, %cst_144 {dimension_numbers = #tpu.dot_dimension_numbers<[1], [0], [0], [1], [0, 0, 1, 1], [], []>} : vector<8x32xf32>, vector<32x128xf32>, vector<8x128xf32> -> vector<8x128xf32>
    %469 = arith.addf %467, %468 : vector<8x128xf32>
    %470 = arith.addf %469, %15 : vector<8x128xf32>
    %471 = math.tanh %470 : vector<8x128xf32>
    %472 = vector.extract_strided_slice %471 {offsets = [0, 0], sizes = [8, 32], strides = [1, 1]} : vector<8x128xf32> to vector<8x32xf32>
    %cst_145 = arith.constant 5.000000e-01 : f32
    %473 = vector.broadcast %cst_145 : f32 to vector<8x32xf32>
    %474 = arith.mulf %473, %472 : vector<8x32xf32>
    %cst_146 = arith.constant 5.000000e-01 : f32
    %475 = vector.broadcast %cst_146 : f32 to vector<8x32xf32>
    %476 = arith.addf %474, %475 : vector<8x32xf32>
    %477 = vector.extract_strided_slice %471 {offsets = [0, 32], sizes = [8, 32], strides = [1, 1]} : vector<8x128xf32> to vector<8x32xf32>
    %cst_147 = arith.constant 5.000000e-01 : f32
    %478 = vector.broadcast %cst_147 : f32 to vector<8x32xf32>
    %479 = arith.mulf %478, %477 : vector<8x32xf32>
    %cst_148 = arith.constant 5.000000e-01 : f32
    %480 = vector.broadcast %cst_148 : f32 to vector<8x32xf32>
    %481 = arith.addf %479, %480 : vector<8x32xf32>
    %482 = vector.extract_strided_slice %471 {offsets = [0, 64], sizes = [8, 32], strides = [1, 1]} : vector<8x128xf32> to vector<8x32xf32>
    %483 = vector.extract_strided_slice %471 {offsets = [0, 96], sizes = [8, 32], strides = [1, 1]} : vector<8x128xf32> to vector<8x32xf32>
    %cst_149 = arith.constant 5.000000e-01 : f32
    %484 = vector.broadcast %cst_149 : f32 to vector<8x32xf32>
    %485 = arith.mulf %484, %483 : vector<8x32xf32>
    %cst_150 = arith.constant 5.000000e-01 : f32
    %486 = vector.broadcast %cst_150 : f32 to vector<8x32xf32>
    %487 = arith.addf %485, %486 : vector<8x32xf32>
    %488 = arith.mulf %481, %436 : vector<8x32xf32>
    %489 = arith.mulf %476, %482 : vector<8x32xf32>
    %490 = arith.addf %488, %489 : vector<8x32xf32>
    %491 = math.tanh %490 : vector<8x32xf32>
    %492 = arith.mulf %487, %491 : vector<8x32xf32>
    %c0_151 = arith.constant 0 : index
    %c0_152 = arith.constant 0 : index
    %493 = vector.load %arg4[%c0_151, %c0_152] : memref<40x32xf32, #tpu.memory_space<vmem>>, vector<8x32xf32>
    tpu.vector_store %arg4[%c0_151, %c0_152], %492 {strides = array<i32>} : memref<40x32xf32, #tpu.memory_space<vmem>>, vector<8x32xf32>,
    %cst_153 = arith.constant dense<0.000000e+00> : vector<8x128xf32>
    %494 = tpu.matmul %492, %442, %cst_153 {dimension_numbers = #tpu.dot_dimension_numbers<[1], [0], [0], [1], [0, 0, 1, 1], [], []>} : vector<8x32xf32>, vector<32x128xf32>, vector<8x128xf32> -> vector<8x128xf32>
    %495 = arith.addf %494, %12 : vector<8x128xf32>
    %cst_154 = arith.constant dense<0.000000e+00> : vector<8x128xf32>
    %496 = tpu.matmul %466, %439, %cst_154 {dimension_numbers = #tpu.dot_dimension_numbers<[1], [0], [0], [1], [0, 0, 1, 1], [], []>} : vector<8x32xf32>, vector<32x128xf32>, vector<8x128xf32> -> vector<8x128xf32>
    %497 = arith.addf %496, %495 : vector<8x128xf32>
    %498 = math.tanh %497 : vector<8x128xf32>
    %499 = vector.extract_strided_slice %498 {offsets = [0, 0], sizes = [8, 32], strides = [1, 1]} : vector<8x128xf32> to vector<8x32xf32>
    %cst_155 = arith.constant 5.000000e-01 : f32
    %500 = vector.broadcast %cst_155 : f32 to vector<8x32xf32>
    %501 = arith.mulf %500, %499 : vector<8x32xf32>
    %cst_156 = arith.constant 5.000000e-01 : f32
    %502 = vector.broadcast %cst_156 : f32 to vector<8x32xf32>
    %503 = arith.addf %501, %502 : vector<8x32xf32>
    %504 = vector.extract_strided_slice %498 {offsets = [0, 32], sizes = [8, 32], strides = [1, 1]} : vector<8x128xf32> to vector<8x32xf32>
    %cst_157 = arith.constant 5.000000e-01 : f32
    %505 = vector.broadcast %cst_157 : f32 to vector<8x32xf32>
    %506 = arith.mulf %505, %504 : vector<8x32xf32>
    %cst_158 = arith.constant 5.000000e-01 : f32
    %507 = vector.broadcast %cst_158 : f32 to vector<8x32xf32>
    %508 = arith.addf %506, %507 : vector<8x32xf32>
    %509 = vector.extract_strided_slice %498 {offsets = [0, 64], sizes = [8, 32], strides = [1, 1]} : vector<8x128xf32> to vector<8x32xf32>
    %510 = vector.extract_strided_slice %498 {offsets = [0, 96], sizes = [8, 32], strides = [1, 1]} : vector<8x128xf32> to vector<8x32xf32>
    %cst_159 = arith.constant 5.000000e-01 : f32
    %511 = vector.broadcast %cst_159 : f32 to vector<8x32xf32>
    %512 = arith.mulf %511, %510 : vector<8x32xf32>
    %cst_160 = arith.constant 5.000000e-01 : f32
    %513 = vector.broadcast %cst_160 : f32 to vector<8x32xf32>
    %514 = arith.addf %512, %513 : vector<8x32xf32>
    %515 = arith.mulf %508, %464 : vector<8x32xf32>
    %516 = arith.mulf %503, %509 : vector<8x32xf32>
    %517 = arith.addf %515, %516 : vector<8x32xf32>
    %518 = math.tanh %517 : vector<8x32xf32>
    %519 = arith.mulf %514, %518 : vector<8x32xf32>
    %cst_161 = arith.constant dense<0.000000e+00> : vector<8x128xf32>
    %520 = tpu.matmul %492, %441, %cst_161 {dimension_numbers = #tpu.dot_dimension_numbers<[1], [0], [0], [1], [0, 0, 1, 1], [], []>} : vector<8x32xf32>, vector<32x128xf32>, vector<8x128xf32> -> vector<8x128xf32>
    %cst_162 = arith.constant dense<0.000000e+00> : vector<8x128xf32>
    %521 = tpu.matmul %519, %440, %cst_162 {dimension_numbers = #tpu.dot_dimension_numbers<[1], [0], [0], [1], [0, 0, 1, 1], [], []>} : vector<8x32xf32>, vector<32x128xf32>, vector<8x128xf32> -> vector<8x128xf32>
    %522 = arith.addf %520, %521 : vector<8x128xf32>
    %523 = arith.addf %522, %15 : vector<8x128xf32>
    %524 = math.tanh %523 : vector<8x128xf32>
    %525 = vector.extract_strided_slice %524 {offsets = [0, 0], sizes = [8, 32], strides = [1, 1]} : vector<8x128xf32> to vector<8x32xf32>
    %cst_163 = arith.constant 5.000000e-01 : f32
    %526 = vector.broadcast %cst_163 : f32 to vector<8x32xf32>
    %527 = arith.mulf %526, %525 : vector<8x32xf32>
    %cst_164 = arith.constant 5.000000e-01 : f32
    %528 = vector.broadcast %cst_164 : f32 to vector<8x32xf32>
    %529 = arith.addf %527, %528 : vector<8x32xf32>
    %530 = vector.extract_strided_slice %524 {offsets = [0, 32], sizes = [8, 32], strides = [1, 1]} : vector<8x128xf32> to vector<8x32xf32>
    %cst_165 = arith.constant 5.000000e-01 : f32
    %531 = vector.broadcast %cst_165 : f32 to vector<8x32xf32>
    %532 = arith.mulf %531, %530 : vector<8x32xf32>
    %cst_166 = arith.constant 5.000000e-01 : f32
    %533 = vector.broadcast %cst_166 : f32 to vector<8x32xf32>
    %534 = arith.addf %532, %533 : vector<8x32xf32>
    %535 = vector.extract_strided_slice %524 {offsets = [0, 64], sizes = [8, 32], strides = [1, 1]} : vector<8x128xf32> to vector<8x32xf32>
    %536 = vector.extract_strided_slice %524 {offsets = [0, 96], sizes = [8, 32], strides = [1, 1]} : vector<8x128xf32> to vector<8x32xf32>
    %cst_167 = arith.constant 5.000000e-01 : f32
    %537 = vector.broadcast %cst_167 : f32 to vector<8x32xf32>
    %538 = arith.mulf %537, %536 : vector<8x32xf32>
    %cst_168 = arith.constant 5.000000e-01 : f32
    %539 = vector.broadcast %cst_168 : f32 to vector<8x32xf32>
    %540 = arith.addf %538, %539 : vector<8x32xf32>
    %541 = arith.mulf %534, %490 : vector<8x32xf32>
    %542 = arith.mulf %529, %535 : vector<8x32xf32>
    %543 = arith.addf %541, %542 : vector<8x32xf32>
    %544 = math.tanh %543 : vector<8x32xf32>
    %545 = arith.mulf %540, %544 : vector<8x32xf32>
    %c8_169 = arith.constant 8 : index
    %c0_170 = arith.constant 0 : index
    %546 = vector.load %arg4[%c8_169, %c0_170] : memref<40x32xf32, #tpu.memory_space<vmem>>, vector<8x32xf32>
    tpu.vector_store %arg4[%c8_169, %c0_170], %545 {strides = array<i32>} : memref<40x32xf32, #tpu.memory_space<vmem>>, vector<8x32xf32>,
    %cst_171 = arith.constant dense<0.000000e+00> : vector<8x128xf32>
    %547 = tpu.matmul %545, %442, %cst_171 {dimension_numbers = #tpu.dot_dimension_numbers<[1], [0], [0], [1], [0, 0, 1, 1], [], []>} : vector<8x32xf32>, vector<32x128xf32>, vector<8x128xf32> -> vector<8x128xf32>
    %548 = arith.addf %547, %12 : vector<8x128xf32>
    %cst_172 = arith.constant dense<0.000000e+00> : vector<8x128xf32>
    %549 = tpu.matmul %519, %439, %cst_172 {dimension_numbers = #tpu.dot_dimension_numbers<[1], [0], [0], [1], [0, 0, 1, 1], [], []>} : vector<8x32xf32>, vector<32x128xf32>, vector<8x128xf32> -> vector<8x128xf32>
    %550 = arith.addf %549, %548 : vector<8x128xf32>
    %551 = math.tanh %550 : vector<8x128xf32>
    %552 = vector.extract_strided_slice %551 {offsets = [0, 0], sizes = [8, 32], strides = [1, 1]} : vector<8x128xf32> to vector<8x32xf32>
    %cst_173 = arith.constant 5.000000e-01 : f32
    %553 = vector.broadcast %cst_173 : f32 to vector<8x32xf32>
    %554 = arith.mulf %553, %552 : vector<8x32xf32>
    %cst_174 = arith.constant 5.000000e-01 : f32
    %555 = vector.broadcast %cst_174 : f32 to vector<8x32xf32>
    %556 = arith.addf %554, %555 : vector<8x32xf32>
    %557 = vector.extract_strided_slice %551 {offsets = [0, 32], sizes = [8, 32], strides = [1, 1]} : vector<8x128xf32> to vector<8x32xf32>
    %cst_175 = arith.constant 5.000000e-01 : f32
    %558 = vector.broadcast %cst_175 : f32 to vector<8x32xf32>
    %559 = arith.mulf %558, %557 : vector<8x32xf32>
    %cst_176 = arith.constant 5.000000e-01 : f32
    %560 = vector.broadcast %cst_176 : f32 to vector<8x32xf32>
    %561 = arith.addf %559, %560 : vector<8x32xf32>
    %562 = vector.extract_strided_slice %551 {offsets = [0, 64], sizes = [8, 32], strides = [1, 1]} : vector<8x128xf32> to vector<8x32xf32>
    %563 = vector.extract_strided_slice %551 {offsets = [0, 96], sizes = [8, 32], strides = [1, 1]} : vector<8x128xf32> to vector<8x32xf32>
    %cst_177 = arith.constant 5.000000e-01 : f32
    %564 = vector.broadcast %cst_177 : f32 to vector<8x32xf32>
    %565 = arith.mulf %564, %563 : vector<8x32xf32>
    %cst_178 = arith.constant 5.000000e-01 : f32
    %566 = vector.broadcast %cst_178 : f32 to vector<8x32xf32>
    %567 = arith.addf %565, %566 : vector<8x32xf32>
    %568 = arith.mulf %561, %517 : vector<8x32xf32>
    %569 = arith.mulf %556, %562 : vector<8x32xf32>
    %570 = arith.addf %568, %569 : vector<8x32xf32>
    %571 = math.tanh %570 : vector<8x32xf32>
    %572 = arith.mulf %567, %571 : vector<8x32xf32>
    %cst_179 = arith.constant dense<0.000000e+00> : vector<8x128xf32>
    %573 = tpu.matmul %545, %441, %cst_179 {dimension_numbers = #tpu.dot_dimension_numbers<[1], [0], [0], [1], [0, 0, 1, 1], [], []>} : vector<8x32xf32>, vector<32x128xf32>, vector<8x128xf32> -> vector<8x128xf32>
    %cst_180 = arith.constant dense<0.000000e+00> : vector<8x128xf32>
    %574 = tpu.matmul %572, %440, %cst_180 {dimension_numbers = #tpu.dot_dimension_numbers<[1], [0], [0], [1], [0, 0, 1, 1], [], []>} : vector<8x32xf32>, vector<32x128xf32>, vector<8x128xf32> -> vector<8x128xf32>
    %575 = arith.addf %573, %574 : vector<8x128xf32>
    %576 = arith.addf %575, %15 : vector<8x128xf32>
    %577 = math.tanh %576 : vector<8x128xf32>
    %578 = vector.extract_strided_slice %577 {offsets = [0, 0], sizes = [8, 32], strides = [1, 1]} : vector<8x128xf32> to vector<8x32xf32>
    %cst_181 = arith.constant 5.000000e-01 : f32
    %579 = vector.broadcast %cst_181 : f32 to vector<8x32xf32>
    %580 = arith.mulf %579, %578 : vector<8x32xf32>
    %cst_182 = arith.constant 5.000000e-01 : f32
    %581 = vector.broadcast %cst_182 : f32 to vector<8x32xf32>
    %582 = arith.addf %580, %581 : vector<8x32xf32>
    %583 = vector.extract_strided_slice %577 {offsets = [0, 32], sizes = [8, 32], strides = [1, 1]} : vector<8x128xf32> to vector<8x32xf32>
    %cst_183 = arith.constant 5.000000e-01 : f32
    %584 = vector.broadcast %cst_183 : f32 to vector<8x32xf32>
    %585 = arith.mulf %584, %583 : vector<8x32xf32>
    %cst_184 = arith.constant 5.000000e-01 : f32
    %586 = vector.broadcast %cst_184 : f32 to vector<8x32xf32>
    %587 = arith.addf %585, %586 : vector<8x32xf32>
    %588 = vector.extract_strided_slice %577 {offsets = [0, 64], sizes = [8, 32], strides = [1, 1]} : vector<8x128xf32> to vector<8x32xf32>
    %589 = vector.extract_strided_slice %577 {offsets = [0, 96], sizes = [8, 32], strides = [1, 1]} : vector<8x128xf32> to vector<8x32xf32>
    %cst_185 = arith.constant 5.000000e-01 : f32
    %590 = vector.broadcast %cst_185 : f32 to vector<8x32xf32>
    %591 = arith.mulf %590, %589 : vector<8x32xf32>
    %cst_186 = arith.constant 5.000000e-01 : f32
    %592 = vector.broadcast %cst_186 : f32 to vector<8x32xf32>
    %593 = arith.addf %591, %592 : vector<8x32xf32>
    %594 = arith.mulf %587, %543 : vector<8x32xf32>
    %595 = arith.mulf %582, %588 : vector<8x32xf32>
    %596 = arith.addf %594, %595 : vector<8x32xf32>
    %597 = math.tanh %596 : vector<8x32xf32>
    %598 = arith.mulf %593, %597 : vector<8x32xf32>
    %c16 = arith.constant 16 : index
    %c0_187 = arith.constant 0 : index
    %599 = vector.load %arg4[%c16, %c0_187] : memref<40x32xf32, #tpu.memory_space<vmem>>, vector<8x32xf32>
    tpu.vector_store %arg4[%c16, %c0_187], %598 {strides = array<i32>} : memref<40x32xf32, #tpu.memory_space<vmem>>, vector<8x32xf32>,
    %cst_188 = arith.constant dense<0.000000e+00> : vector<8x128xf32>
    %600 = tpu.matmul %598, %442, %cst_188 {dimension_numbers = #tpu.dot_dimension_numbers<[1], [0], [0], [1], [0, 0, 1, 1], [], []>} : vector<8x32xf32>, vector<32x128xf32>, vector<8x128xf32> -> vector<8x128xf32>
    %601 = arith.addf %600, %12 : vector<8x128xf32>
    %cst_189 = arith.constant dense<0.000000e+00> : vector<8x128xf32>
    %602 = tpu.matmul %572, %439, %cst_189 {dimension_numbers = #tpu.dot_dimension_numbers<[1], [0], [0], [1], [0, 0, 1, 1], [], []>} : vector<8x32xf32>, vector<32x128xf32>, vector<8x128xf32> -> vector<8x128xf32>
    %603 = arith.addf %602, %601 : vector<8x128xf32>
    %604 = math.tanh %603 : vector<8x128xf32>
    %605 = vector.extract_strided_slice %604 {offsets = [0, 0], sizes = [8, 32], strides = [1, 1]} : vector<8x128xf32> to vector<8x32xf32>
    %cst_190 = arith.constant 5.000000e-01 : f32
    %606 = vector.broadcast %cst_190 : f32 to vector<8x32xf32>
    %607 = arith.mulf %606, %605 : vector<8x32xf32>
    %cst_191 = arith.constant 5.000000e-01 : f32
    %608 = vector.broadcast %cst_191 : f32 to vector<8x32xf32>
    %609 = arith.addf %607, %608 : vector<8x32xf32>
    %610 = vector.extract_strided_slice %604 {offsets = [0, 32], sizes = [8, 32], strides = [1, 1]} : vector<8x128xf32> to vector<8x32xf32>
    %cst_192 = arith.constant 5.000000e-01 : f32
    %611 = vector.broadcast %cst_192 : f32 to vector<8x32xf32>
    %612 = arith.mulf %611, %610 : vector<8x32xf32>
    %cst_193 = arith.constant 5.000000e-01 : f32
    %613 = vector.broadcast %cst_193 : f32 to vector<8x32xf32>
    %614 = arith.addf %612, %613 : vector<8x32xf32>
    %615 = vector.extract_strided_slice %604 {offsets = [0, 64], sizes = [8, 32], strides = [1, 1]} : vector<8x128xf32> to vector<8x32xf32>
    %616 = vector.extract_strided_slice %604 {offsets = [0, 96], sizes = [8, 32], strides = [1, 1]} : vector<8x128xf32> to vector<8x32xf32>
    %cst_194 = arith.constant 5.000000e-01 : f32
    %617 = vector.broadcast %cst_194 : f32 to vector<8x32xf32>
    %618 = arith.mulf %617, %616 : vector<8x32xf32>
    %cst_195 = arith.constant 5.000000e-01 : f32
    %619 = vector.broadcast %cst_195 : f32 to vector<8x32xf32>
    %620 = arith.addf %618, %619 : vector<8x32xf32>
    %621 = arith.mulf %614, %570 : vector<8x32xf32>
    %622 = arith.mulf %609, %615 : vector<8x32xf32>
    %623 = arith.addf %621, %622 : vector<8x32xf32>
    %624 = math.tanh %623 : vector<8x32xf32>
    %625 = arith.mulf %620, %624 : vector<8x32xf32>
    %cst_196 = arith.constant dense<0.000000e+00> : vector<8x128xf32>
    %626 = tpu.matmul %598, %441, %cst_196 {dimension_numbers = #tpu.dot_dimension_numbers<[1], [0], [0], [1], [0, 0, 1, 1], [], []>} : vector<8x32xf32>, vector<32x128xf32>, vector<8x128xf32> -> vector<8x128xf32>
    %cst_197 = arith.constant dense<0.000000e+00> : vector<8x128xf32>
    %627 = tpu.matmul %625, %440, %cst_197 {dimension_numbers = #tpu.dot_dimension_numbers<[1], [0], [0], [1], [0, 0, 1, 1], [], []>} : vector<8x32xf32>, vector<32x128xf32>, vector<8x128xf32> -> vector<8x128xf32>
    %628 = arith.addf %626, %627 : vector<8x128xf32>
    %629 = arith.addf %628, %15 : vector<8x128xf32>
    %630 = math.tanh %629 : vector<8x128xf32>
    %631 = vector.extract_strided_slice %630 {offsets = [0, 0], sizes = [8, 32], strides = [1, 1]} : vector<8x128xf32> to vector<8x32xf32>
    %cst_198 = arith.constant 5.000000e-01 : f32
    %632 = vector.broadcast %cst_198 : f32 to vector<8x32xf32>
    %633 = arith.mulf %632, %631 : vector<8x32xf32>
    %cst_199 = arith.constant 5.000000e-01 : f32
    %634 = vector.broadcast %cst_199 : f32 to vector<8x32xf32>
    %635 = arith.addf %633, %634 : vector<8x32xf32>
    %636 = vector.extract_strided_slice %630 {offsets = [0, 32], sizes = [8, 32], strides = [1, 1]} : vector<8x128xf32> to vector<8x32xf32>
    %cst_200 = arith.constant 5.000000e-01 : f32
    %637 = vector.broadcast %cst_200 : f32 to vector<8x32xf32>
    %638 = arith.mulf %637, %636 : vector<8x32xf32>
    %cst_201 = arith.constant 5.000000e-01 : f32
    %639 = vector.broadcast %cst_201 : f32 to vector<8x32xf32>
    %640 = arith.addf %638, %639 : vector<8x32xf32>
    %641 = vector.extract_strided_slice %630 {offsets = [0, 64], sizes = [8, 32], strides = [1, 1]} : vector<8x128xf32> to vector<8x32xf32>
    %642 = vector.extract_strided_slice %630 {offsets = [0, 96], sizes = [8, 32], strides = [1, 1]} : vector<8x128xf32> to vector<8x32xf32>
    %cst_202 = arith.constant 5.000000e-01 : f32
    %643 = vector.broadcast %cst_202 : f32 to vector<8x32xf32>
    %644 = arith.mulf %643, %642 : vector<8x32xf32>
    %cst_203 = arith.constant 5.000000e-01 : f32
    %645 = vector.broadcast %cst_203 : f32 to vector<8x32xf32>
    %646 = arith.addf %644, %645 : vector<8x32xf32>
    %647 = arith.mulf %640, %596 : vector<8x32xf32>
    %648 = arith.mulf %635, %641 : vector<8x32xf32>
    %649 = arith.addf %647, %648 : vector<8x32xf32>
    %650 = math.tanh %649 : vector<8x32xf32>
    %651 = arith.mulf %646, %650 : vector<8x32xf32>
    %c24 = arith.constant 24 : index
    %c0_204 = arith.constant 0 : index
    %652 = vector.load %arg4[%c24, %c0_204] : memref<40x32xf32, #tpu.memory_space<vmem>>, vector<8x32xf32>
    tpu.vector_store %arg4[%c24, %c0_204], %651 {strides = array<i32>} : memref<40x32xf32, #tpu.memory_space<vmem>>, vector<8x32xf32>,
    %cst_205 = arith.constant dense<0.000000e+00> : vector<8x128xf32>
    %653 = tpu.matmul %651, %442, %cst_205 {dimension_numbers = #tpu.dot_dimension_numbers<[1], [0], [0], [1], [0, 0, 1, 1], [], []>} : vector<8x32xf32>, vector<32x128xf32>, vector<8x128xf32> -> vector<8x128xf32>
    %654 = arith.addf %653, %12 : vector<8x128xf32>
    %cst_206 = arith.constant dense<0.000000e+00> : vector<8x128xf32>
    %655 = tpu.matmul %625, %439, %cst_206 {dimension_numbers = #tpu.dot_dimension_numbers<[1], [0], [0], [1], [0, 0, 1, 1], [], []>} : vector<8x32xf32>, vector<32x128xf32>, vector<8x128xf32> -> vector<8x128xf32>
    %656 = arith.addf %655, %654 : vector<8x128xf32>
    %657 = math.tanh %656 : vector<8x128xf32>
    %658 = vector.extract_strided_slice %657 {offsets = [0, 0], sizes = [8, 32], strides = [1, 1]} : vector<8x128xf32> to vector<8x32xf32>
    %cst_207 = arith.constant 5.000000e-01 : f32
    %659 = vector.broadcast %cst_207 : f32 to vector<8x32xf32>
    %660 = arith.mulf %659, %658 : vector<8x32xf32>
    %cst_208 = arith.constant 5.000000e-01 : f32
    %661 = vector.broadcast %cst_208 : f32 to vector<8x32xf32>
    %662 = arith.addf %660, %661 : vector<8x32xf32>
    %663 = vector.extract_strided_slice %657 {offsets = [0, 32], sizes = [8, 32], strides = [1, 1]} : vector<8x128xf32> to vector<8x32xf32>
    %cst_209 = arith.constant 5.000000e-01 : f32
    %664 = vector.broadcast %cst_209 : f32 to vector<8x32xf32>
    %665 = arith.mulf %664, %663 : vector<8x32xf32>
    %cst_210 = arith.constant 5.000000e-01 : f32
    %666 = vector.broadcast %cst_210 : f32 to vector<8x32xf32>
    %667 = arith.addf %665, %666 : vector<8x32xf32>
    %668 = vector.extract_strided_slice %657 {offsets = [0, 64], sizes = [8, 32], strides = [1, 1]} : vector<8x128xf32> to vector<8x32xf32>
    %669 = vector.extract_strided_slice %657 {offsets = [0, 96], sizes = [8, 32], strides = [1, 1]} : vector<8x128xf32> to vector<8x32xf32>
    %cst_211 = arith.constant 5.000000e-01 : f32
    %670 = vector.broadcast %cst_211 : f32 to vector<8x32xf32>
    %671 = arith.mulf %670, %669 : vector<8x32xf32>
    %cst_212 = arith.constant 5.000000e-01 : f32
    %672 = vector.broadcast %cst_212 : f32 to vector<8x32xf32>
    %673 = arith.addf %671, %672 : vector<8x32xf32>
    %674 = arith.mulf %667, %623 : vector<8x32xf32>
    %675 = arith.mulf %662, %668 : vector<8x32xf32>
    %676 = arith.addf %674, %675 : vector<8x32xf32>
    %677 = math.tanh %676 : vector<8x32xf32>
    %678 = arith.mulf %673, %677 : vector<8x32xf32>
    %cst_213 = arith.constant dense<0.000000e+00> : vector<8x128xf32>
    %679 = tpu.matmul %651, %441, %cst_213 {dimension_numbers = #tpu.dot_dimension_numbers<[1], [0], [0], [1], [0, 0, 1, 1], [], []>} : vector<8x32xf32>, vector<32x128xf32>, vector<8x128xf32> -> vector<8x128xf32>
    %cst_214 = arith.constant dense<0.000000e+00> : vector<8x128xf32>
    %680 = tpu.matmul %678, %440, %cst_214 {dimension_numbers = #tpu.dot_dimension_numbers<[1], [0], [0], [1], [0, 0, 1, 1], [], []>} : vector<8x32xf32>, vector<32x128xf32>, vector<8x128xf32> -> vector<8x128xf32>
    %681 = arith.addf %679, %680 : vector<8x128xf32>
    %682 = arith.addf %681, %15 : vector<8x128xf32>
    %683 = math.tanh %682 : vector<8x128xf32>
    %684 = vector.extract_strided_slice %683 {offsets = [0, 0], sizes = [8, 32], strides = [1, 1]} : vector<8x128xf32> to vector<8x32xf32>
    %cst_215 = arith.constant 5.000000e-01 : f32
    %685 = vector.broadcast %cst_215 : f32 to vector<8x32xf32>
    %686 = arith.mulf %685, %684 : vector<8x32xf32>
    %cst_216 = arith.constant 5.000000e-01 : f32
    %687 = vector.broadcast %cst_216 : f32 to vector<8x32xf32>
    %688 = arith.addf %686, %687 : vector<8x32xf32>
    %689 = vector.extract_strided_slice %683 {offsets = [0, 32], sizes = [8, 32], strides = [1, 1]} : vector<8x128xf32> to vector<8x32xf32>
    %cst_217 = arith.constant 5.000000e-01 : f32
    %690 = vector.broadcast %cst_217 : f32 to vector<8x32xf32>
    %691 = arith.mulf %690, %689 : vector<8x32xf32>
    %cst_218 = arith.constant 5.000000e-01 : f32
    %692 = vector.broadcast %cst_218 : f32 to vector<8x32xf32>
    %693 = arith.addf %691, %692 : vector<8x32xf32>
    %694 = vector.extract_strided_slice %683 {offsets = [0, 64], sizes = [8, 32], strides = [1, 1]} : vector<8x128xf32> to vector<8x32xf32>
    %695 = vector.extract_strided_slice %683 {offsets = [0, 96], sizes = [8, 32], strides = [1, 1]} : vector<8x128xf32> to vector<8x32xf32>
    %cst_219 = arith.constant 5.000000e-01 : f32
    %696 = vector.broadcast %cst_219 : f32 to vector<8x32xf32>
    %697 = arith.mulf %696, %695 : vector<8x32xf32>
    %cst_220 = arith.constant 5.000000e-01 : f32
    %698 = vector.broadcast %cst_220 : f32 to vector<8x32xf32>
    %699 = arith.addf %697, %698 : vector<8x32xf32>
    %700 = arith.mulf %693, %649 : vector<8x32xf32>
    %701 = arith.mulf %688, %694 : vector<8x32xf32>
    %702 = arith.addf %700, %701 : vector<8x32xf32>
    %703 = math.tanh %702 : vector<8x32xf32>
    %704 = arith.mulf %699, %703 : vector<8x32xf32>
    %c32 = arith.constant 32 : index
    %c0_221 = arith.constant 0 : index
    %705 = vector.load %arg4[%c32, %c0_221] : memref<40x32xf32, #tpu.memory_space<vmem>>, vector<8x32xf32>
    tpu.vector_store %arg4[%c32, %c0_221], %704 {strides = array<i32>} : memref<40x32xf32, #tpu.memory_space<vmem>>, vector<8x32xf32>,
    %c0_222 = arith.constant 0 : index
    %c0_223 = arith.constant 0 : index
    %706 = vector.load %arg4[%c0_222, %c0_223] : memref<40x32xf32, #tpu.memory_space<vmem>>, vector<40x32xf32>
    %c240 = arith.constant 240 : index
    %c0_224 = arith.constant 0 : index
    %707 = vector.load %arg1[%c240, %c0_224] : memref<272x128xf32, #tpu.memory_space<vmem>>, vector<32x128xf32>
    %cst_225 = arith.constant dense<0.000000e+00> : vector<40x128xf32>
    %708 = tpu.matmul %706, %707, %cst_225 {dimension_numbers = #tpu.dot_dimension_numbers<[1], [0], [0], [1], [0, 0, 1, 1], [], []>} : vector<40x32xf32>, vector<32x128xf32>, vector<40x128xf32> -> vector<40x128xf32>
    %709 = arith.addf %708, %18 : vector<40x128xf32>
    %c0_226 = arith.constant 0 : index
    %c0_227 = arith.constant 0 : index
    %710 = vector.load %arg3[%c0_226, %c0_227] : memref<40x128xf32, #tpu.memory_space<vmem>>, vector<40x128xf32>
    tpu.vector_store %arg3[%c0_226, %c0_227], %709 {strides = array<i32>} : memref<40x128xf32, #tpu.memory_space<vmem>>, vector<40x128xf32>,
    return
  }
}

</mosaic_0001>

<bundles_post_ra>
// kernel: model_forward.1
= control target key start
LH: loop header
LB: loop body
LE: loop exit
PB: predicated region body
PF: predicated region fallthrough
CT: control target
= control target key end

     0   :  { %vm30_vm0 = vcmask 64512   ;;  %v1910_v8 = vmov 0.0   ;;  %s1911_s30 = smov 64   ;;  %s1912_s4 = smov 32   ;;  %vm129_vm1 = vcmask 261120   ;;  %s2555_s1 = inlined_call_operand.vmem [shape: f32[272,128], index: 1, kind: input, shape index: {}]   ;;  %s2556_s0 = inlined_call_operand.vmem [shape: f32[64,8], index: 0, kind: input, shape index: {}]   ;;  %s2557_s2 = inlined_call_operand.vmem [shape: f32[8,128], index: 2, kind: input, shape index: {}]   ;;  %s2558_s3 = inlined_call_operand.vmem [shape: f32[40,128], index: 3, kind: output, shape index: {}]  }
   0x1   :  { %v29_v0 = vld [vmem:[%s2555_s1] sm:$0xff]  ;;  %v27_v1 = vld [vmem:[%s2556_s0 + $0x30] sm:$0xff]  ;;  %v1948_v3 = vld [vmem:[%s2555_s1 + $0x18] sm:$0xff] }
   0x2   :  { %v1942_v2 = vld [vmem:[%s2555_s1 + $0x20] sm:$0xff]  ;;  %1801 = vmatpush.msra.mxu2 %v29_v0  ;;  %70 = vmatpush.msra.mxu0 %v29_v0  ;;  %v1958_v5 = vld [vmem:[%s2555_s1 + $0x10] sm:$0xff]  ;;  %v1964_v6 = vld [vmem:[%s2555_s1 + $0x8] sm:$0xff] }
   0x3   :  { %1751 = vmatmul.msk.f32.vlgmr.msra.gmra.mxu2 %vm30_vm0, %v27_v1  ;;  %v21_v4 = vld [vmem:[%s2556_s0] sm:$0xff]  ;;  %1800 = vmatpush.msra.mxu1 %v29_v0  ;;  %v28_v7 = vld [vmem:[%s2556_s0 + $0x38] sm:$0xff]  ;;  %v26_v26 = vld [vmem:[%s2556_s0 + $0x28] sm:$0xff] }
   0x4   :  { %145 = vmatpush.msrb.mxu2 %v1942_v2  ;;  %1745 = vmatmul.msk.f32.vlgmr.msra.gmra.mxu0 %vm30_vm0, %v21_v4  ;;  %v1985_v10 = vld [vmem:[%s2557_s2] sm:$0xff]  ;;  %v2010_v28 = vld [vmem:[%s2555_s1 + $0x38] sm:$0xff]  ;;  %v96_v29 = vld [vmem:[%s2555_s1 + $0x68] sm:$0xff] }
   0x5   :  { %v1990_v13 = vperm.slane %v1985_v10, 0  ;;  %v2005_v27 = vld [vmem:[%s2555_s1 + $0x40] sm:$0xff]  ;;  %1750 = vmatmul.msk.f32.vlgmr.msra.gmra.mxu1 %vm30_vm0, %v26_v26  ;;  %v2020_v30 = vld [vmem:[%s2555_s1 + $0x30] sm:$0xff]  ;;  %v2032_v32 = vld [vmem:[%s2555_s1 + $0x28] sm:$0xff]  ;;  %v2088_v48 = vperm.slane %v1985_v10, 1 }
   0x6   :  { %146 = vmatpush.msrb.mxu2 %v1948_v3  ;;  %190 = vmatpush.msra.mxu3 %v2005_v27  ;;  %v2025_v31 = vld [vmem:[%s2555_s1 + $0x60] sm:$0xff]  ;;  %v2045_v35 = vld [vmem:[%s2555_s1 + $0x58] sm:$0xff]  ;;  %v2050_v36 = vld [vmem:[%s2555_s1 + $0x50] sm:$0xff] }
   0x7   :  { %112 = vmatpush.msrb.mxu1 %v96_v29  ;;  %v22_v37 = vld [vmem:[%s2556_s0 + $0x8] sm:$0xff] }
   0x8   :  { %147 = vmatpush.msrb.mxu2 %v1958_v5  ;;  %191 = vmatpush.msra.mxu3 %v2010_v28  ;;  %v2060_v38 = vld [vmem:[%s2555_s1 + $0x48] sm:$0xff] }
   0x9   :  { %210 = vmatpush.msra.mxu1 %v2025_v31 }
   0xa   :  { %148 = vmatpush.msrb.mxu2 %v1964_v6  ;;  %192 = vmatpush.msra.mxu3 %v2020_v30 }
   0xb   :  { %1752 = vmatmul.msk.f32.gmra.mxu2 %vm30_vm0, %v28_v7  ;;  %211 = vmatpush.msra.mxu1 %v2045_v35 }
   0xc   :  { %251 = vmatpush.msra.mxu2 %v1942_v2  ;;  %193 = vmatpush.msra.mxu3 %v2032_v32 }
   0xd   :  { %1753 = vmatmul.msk.f32.vlgmr.msrb.gmra.mxu1 %vm30_vm0, %v28_v7  ;;  %1746 = vmatmul.msk.f32.gmra.mxu0 %vm30_vm0, %v22_v37 }
   0xe   :  { %252 = vmatpush.msra.mxu2 %v1948_v3  ;;  %296 = vmatpush.msrb.mxu3 %v2005_v27 }
   0xf   :  { %212 = vmatpush.msra.mxu1 %v2050_v36 }
  0x10   :  { %253 = vmatpush.msra.mxu2 %v1958_v5  ;;  %297 = vmatpush.msrb.mxu3 %v2010_v28 }
  0x11   :  { %213 = vmatpush.msra.mxu1 %v2060_v38 }
  0x12   :  { %254 = vmatpush.msra.mxu2 %v1964_v6  ;;  %298 = vmatpush.msrb.mxu3 %v2020_v30 }
  0x13   :  { %149 = vmatmul.f32.vlgmr.msrb.gmra.mxu2 %v1910_v8  ;;  %321 = vmatpush.msrb.mxu1 %v2025_v31 }
  0x14   :  { %362 = vmatpush.msrb.mxu2 %v1942_v2  ;;  %299 = vmatpush.msrb.mxu3 %v2032_v32 }
  0x15   :  { %214 = vmatmul.f32.vlgmr.msra.gmra.mxu1 %v1910_v8 }
  0x16   :  { %363 = vmatpush.msrb.mxu2 %v1948_v3  ;;  %322 = vmatpush.msrb.mxu1 %v2045_v35 }
  0x18   :  { %364 = vmatpush.msrb.mxu2 %v1958_v5  ;;  %323 = vmatpush.msrb.mxu1 %v2050_v36 }
  0x1a   :  { %365 = vmatpush.msrb.mxu2 %v1964_v6  ;;  %324 = vmatpush.msrb.mxu1 %v2060_v38 }
  0x1c   :  { %432 = vmatpush.msra.mxu1 %v2025_v31 }
  0x1e   :  { %433 = vmatpush.msra.mxu1 %v2045_v35 }
  0x20   :  { %434 = vmatpush.msra.mxu1 %v2050_v36 }
  0x22   :  { %435 = vmatpush.msra.mxu1 %v2060_v38 }
  0x81   :  { %v72_v12 = vpop.f32.mrf.mxu0 }
  0x82   :  { %v73_v14 = vadd.f32 %v72_v12, %v1990_v13  ;;  %v2082_v40 = vpop.f32.mrf.mxu1 }
  0x86   :  { %v1980_v9 = vpop.f32.mrf.mxu2 }
  0x8a   :  { %v2084_v41 = vpop.f32.mrf.mxu1  ;;  %v75_v42 = vpop.f32.mrf.mxu0 }
  0x8b   :  { %v76_v43 = vadd.f32 %v75_v42, %v1990_v13 }
  0x8e   :  { %v1987_v11 = vpop.f32.mrf.mxu2 }
  0x92   :  { %v215_v44 = vpop.f32.mrf.mxu1 }
  0x96   :  { %v150_v15 = vpop.f32.mrf.mxu2 }
  0x97   :  { %v151_v16 = vadd.f32 %v150_v15, %v73_v14 }
  0x99   :  { %1805 = vtanh.f32 %v151_v16 }
  0x9f   :  { %v1806_v17 = vpop.eup %1805 }
  0xa0   :  { %158 = vrot.lane.b32.xlu0 %v1806_v17, %s1911_s30  ;;  %v154_v18 = vmul.f32 0.5, %v1806_v17  ;;  %v23_v17 = vld [vmem:[%s2556_s0 + $0x10] sm:$0xff] }
  0xa1   :  { %1747 = vmatmul.msk.f32.gmra.mxu0 %vm30_vm0, %v23_v17 }
  0xa2   :  { %v155_v19 = vadd.f32 0.5, %v154_v18 }
  0xa4   :  { %v156_v22 = vmul.f32 0.0, %v155_v19 }
 0x112   :  { %v159_v20 = vpop.permute.xlu0 %158 }
 0x113   :  { %v161_v21 = vmul.f32 %v159_v20, %v155_v19 }
 0x115   :  { %163 = vrot.lane.b32.xlu0 %v161_v21, %s1912_s4 }
 0x11e   :  { %v78_v20 = vpop.f32.mrf.mxu0 }
 0x11f   :  { %v79_v21 = vadd.f32 %v78_v20, %v1990_v13 }
 0x187   :  { %v164_v23 = vpop.permute.xlu0 %163 }
 0x188   :  { %v1995_v24 = vadd.f32 %v164_v23, %v156_v22 }
 0x18a   :  { %1807 = vtanh.f32 %v1995_v24 }
 0x190   :  { %v1808_v25 = vpop.eup %1807 }
 0x191   :  { %169 = vrot.lane.b32.xlu1 %v1808_v25, %s1911_s30 }
 0x203   :  { %v170_v33 = vpop.permute.xlu1 %169 }
 0x204   :  { %v172_v34 = vmul.f32 %v170_v33, %v155_v19 }
 0x206   :  { %174 = vrot.lane.b32.xlu1 %v172_v34, %s1912_s4 }
 0x278   :  { %v175_v39 = vpop.permute.xlu1 %174 }
 0x279   :  { %1754 = vmatmul.msk.f32.vlgmr.msra.gmra.mxu3 %vm129_vm1, %v175_v39  ;;  %1755 = vmatmul.msk.f32.vlgmr.msra.gmra.mxu2 %vm129_vm1, %v175_v39 }
 0x27a   :  { %473 = vmatpush.msra.mxu2 %v1942_v2  ;;  %407 = vmatpush.msra.mxu3 %v2005_v27 }
 0x27c   :  { %474 = vmatpush.msra.mxu2 %v1948_v3  ;;  %408 = vmatpush.msra.mxu3 %v2010_v28 }
 0x27e   :  { %475 = vmatpush.msra.mxu2 %v1958_v5  ;;  %409 = vmatpush.msra.mxu3 %v2020_v30 }
 0x280   :  { %476 = vmatpush.msra.mxu2 %v1964_v6  ;;  %410 = vmatpush.msra.mxu3 %v2032_v32 }
 0x2fc   :  { %v195_v45 = vpop.f32.mrf.mxu3  ;;  %v256_v46 = vpop.f32.mrf.mxu2 }
 0x2fd   :  { %v257_v47 = vadd.f32 %v256_v46, %v76_v43  ;;  %v216_v49 = vadd.f32 %v215_v44, %v195_v45 }
 0x2ff   :  { %1809 = vtanh.f32 %v257_v47  ;;  %v218_v50 = vadd.f32 %v216_v49, %v2088_v48 }
 0x301   :  { %1811 = vtanh.f32 %v218_v50 }
 0x305   :  { %v1810_v51 = vpop.eup %1809 }
 0x306   :  { %264 = vrot.lane.b32.xlu2 %v1810_v51, %s1911_s30  ;;  %v260_v53 = vmul.f32 0.5, %v1810_v51 }
 0x307   :  { %v1812_v52 = vpop.eup %1811 }
 0x308   :  { %v261_v54 = vadd.f32 0.5, %v260_v53  ;;  %v220_v57 = vmul.f32 0.5, %v1812_v52 }
 0x30a   :  { %v221_v58 = vadd.f32 0.5, %v220_v57  ;;  %v262_v61 = vmul.f32 %v261_v54, %v1995_v24 }
 0x30c   :  { %v222_v0 = vmul.f32 0.0, %v221_v58 }
 0x30e   :  { %224 = vrot.lane.b32.xlu2 %v1812_v52, %s1911_s30 }
 0x360   :  { %v265_v55 = vpop.permute.xlu2 %264 }
 0x361   :  { %v267_v56 = vmul.f32 %v265_v55, %v261_v54 }
 0x363   :  { %269 = vrot.lane.b32.xlu0 %v267_v56, %s1912_s4 }
 0x368   :  { %v225_v59 = vpop.permute.xlu2 %224 }
 0x369   :  { %v227_v60 = vmul.f32 %v225_v59, %v221_v58 }
 0x36b   :  { %229 = vrot.lane.b32.xlu1 %v227_v60, %s1912_s4 }
 0x3d5   :  { %v270_v62 = vpop.permute.xlu0 %269 }
 0x3d6   :  { %v272_v63 = vadd.f32 %v270_v62, %v262_v61  ;;  %v24_v61 = vld [vmem:[%s2556_s0 + $0x18] sm:$0xff] }
 0x3d7   :  { %1748 = vmatmul.msk.f32.gmra.mxu0 %vm30_vm0, %v24_v61 }
 0x3d8   :  { %1813 = vtanh.f32 %v272_v63 }
 0x3dd   :  { %v230_v1 = vpop.permute.xlu1 %229 }
 0x3de   :  { %v1814_v4 = vpop.eup %1813  ;;  %v232_v7 = vadd.f32 %v230_v1, %v222_v0 }
 0x3df   :  { %275 = vrot.lane.b32.xlu2 %v1814_v4, %s1911_s30 }
 0x3e0   :  { %1815 = vtanh.f32 %v232_v7 }
 0x3e6   :  { %v1816_v8 = vpop.eup %1815 }
 0x3e7   :  { %235 = vrot.lane.b32.xlu0 %v1816_v8, %s1911_s30 }
 0x439   :  { %v276_v12 = vpop.permute.xlu2 %275 }
 0x43a   :  { %v278_v14 = vmul.f32 %v276_v12, %v261_v54 }
 0x43c   :  { %280 = vrot.lane.b32.xlu1 %v278_v14, %s1912_s4 }
 0x454   :  { %v81_v0 = vpop.f32.mrf.mxu0 }
 0x455   :  { %v82_v1 = vadd.f32 %v81_v0, %v1990_v13 }
 0x459   :  { %v236_v15 = vpop.permute.xlu0 %235 }
 0x45a   :  { %v238_v16 = vmul.f32 %v236_v15, %v221_v58 }
 0x45c   :  { %305 = vrot.lane.b32.xlu2 %v238_v16, %s1912_s4 }
 0x4ae   :  { %v281_v18 = vpop.permute.xlu1 %280 }
 0x4af   :  { %1756 = vmatmul.msk.f32.vlgmr.msrb.gmra.mxu3 %vm129_vm1, %v281_v18  ;;  %1758 = vmatmul.msk.f32.vlgmr.msrb.gmra.mxu2 %vm129_vm1, %v281_v18 }
 0x4b0   :  { %584 = vmatpush.msrb.mxu2 %v1942_v2  ;;  %518 = vmatpush.msrb.mxu3 %v2005_v27 }
 0x4b2   :  { %585 = vmatpush.msrb.mxu2 %v1948_v3  ;;  %519 = vmatpush.msrb.mxu3 %v2010_v28 }
 0x4b4   :  { %586 = vmatpush.msrb.mxu2 %v1958_v5  ;;  %520 = vmatpush.msrb.mxu3 %v2020_v30 }
 0x4b6   :  { %v306_v19 = vpop.permute.xlu2 %305  ;;  %587 = vmatpush.msrb.mxu2 %v1964_v6  ;;  %521 = vmatpush.msrb.mxu3 %v2032_v32 }
 0x4b7   :  { %1757 = vmatmul.msk.f32.vlgmr.msrb.gmra.mxu1 %vm129_vm1, %v306_v19 }
 0x4b8   :  { %543 = vmatpush.msrb.mxu1 %v2025_v31 }
 0x4ba   :  { %544 = vmatpush.msrb.mxu1 %v2045_v35 }
 0x4bc   :  { %545 = vmatpush.msrb.mxu1 %v2050_v36 }
 0x4be   :  { %546 = vmatpush.msrb.mxu1 %v2060_v38 }
 0x532   :  { %v367_v22 = vpop.f32.mrf.mxu2  ;;  %v301_v24 = vpop.f32.mrf.mxu3 }
 0x533   :  { %v368_v23 = vadd.f32 %v367_v22, %v79_v21 }
 0x534   :  { %v326_v25 = vpop.f32.mrf.mxu1 }
 0x535   :  { %1817 = vtanh.f32 %v368_v23  ;;  %v327_v26 = vadd.f32 %v326_v25, %v301_v24 }
 0x537   :  { %v329_v29 = vadd.f32 %v327_v26, %v2088_v48 }
 0x539   :  { %1819 = vtanh.f32 %v329_v29 }
 0x53b   :  { %v1818_v33 = vpop.eup %1817 }
 0x53c   :  { %375 = vrot.lane.b32.xlu0 %v1818_v33, %s1911_s30  ;;  %v371_v37 = vmul.f32 0.5, %v1818_v33 }
 0x53e   :  { %v372_v39 = vadd.f32 0.5, %v371_v37 }
 0x53f   :  { %v1820_v34 = vpop.eup %1819 }
 0x540   :  { %335 = vrot.lane.b32.xlu1 %v1820_v34, %s1911_s30  ;;  %v331_v42 = vmul.f32 0.5, %v1820_v34  ;;  %v373_v49 = vmul.f32 %v372_v39, %v272_v63 }
 0x542   :  { %v332_v45 = vadd.f32 0.5, %v331_v42 }
 0x544   :  { %v333_v53 = vmul.f32 %v332_v45, %v232_v7 }
 0x5ae   :  { %v376_v43 = vpop.permute.xlu0 %375 }
 0x5af   :  { %v378_v44 = vmul.f32 %v376_v43, %v372_v39 }
 0x5b1   :  { %380 = vrot.lane.b32.xlu2 %v378_v44, %s1912_s4 }
 0x5b2   :  { %v336_v46 = vpop.permute.xlu1 %335 }
 0x5b3   :  { %v338_v47 = vmul.f32 %v336_v46, %v332_v45 }
 0x5b5   :  { %340 = vrot.lane.b32.xlu0 %v338_v47, %s1912_s4 }
 0x60b   :  { %v381_v50 = vpop.permute.xlu2 %380 }
 0x60c   :  { %v383_v51 = vadd.f32 %v381_v50, %v373_v49  ;;  %v25_v49 = vld [vmem:[%s2556_s0 + $0x20] sm:$0xff] }
 0x60d   :  { %1749 = vmatmul.msk.f32.gmra.mxu0 %vm30_vm0, %v25_v49 }
 0x60e   :  { %1821 = vtanh.f32 %v383_v51 }
 0x614   :  { %v1822_v52 = vpop.eup %1821 }
 0x615   :  { %386 = vrot.lane.b32.xlu1 %v1822_v52, %s1911_s30 }
 0x627   :  { %v341_v54 = vpop.permute.xlu0 %340 }
 0x628   :  { %v343_v55 = vadd.f32 %v341_v54, %v333_v53 }
 0x62a   :  { %1823 = vtanh.f32 %v343_v55 }
 0x630   :  { %v1824_v56 = vpop.eup %1823 }
 0x631   :  { %346 = vrot.lane.b32.xlu2 %v1824_v56, %s1911_s30 }
 0x687   :  { %v387_v57 = vpop.permute.xlu1 %386 }
 0x688   :  { %v389_v58 = vmul.f32 %v387_v57, %v372_v39 }
 0x68a   :  { %391 = vrot.lane.b32.xlu0 %v389_v58, %s1912_s4  ;;  %v84_v52 = vpop.f32.mrf.mxu0 }
 0x68b   :  { %v347_v59 = vpop.permute.xlu2 %346  ;;  %v85_v53 = vadd.f32 %v84_v52, %v1990_v13 }
 0x68c   :  { %v349_v60 = vmul.f32 %v347_v59, %v332_v45 }
 0x68e   :  { %416 = vrot.lane.b32.xlu1 %v349_v60, %s1912_s4 }
 0x6fc   :  { %v392_v62 = vpop.permute.xlu0 %391 }
 0x6fd   :  { %1759 = vmatmul.msk.f32.vlgmr.msra.gmra.mxu3 %vm129_vm1, %v392_v62  ;;  %1761 = vmatmul.msk.f32.vlgmr.msra.gmra.mxu2 %vm129_vm1, %v392_v62 }
 0x6fe   :  { %695 = vmatpush.msra.mxu2 %v1942_v2  ;;  %629 = vmatpush.msra.mxu3 %v2005_v27 }
 0x700   :  { %v417_v63 = vpop.permute.xlu1 %416  ;;  %696 = vmatpush.msra.mxu2 %v1948_v3  ;;  %630 = vmatpush.msra.mxu3 %v2010_v28 }
 0x701   :  { %1760 = vmatmul.msk.f32.vlgmr.msra.gmra.mxu1 %vm129_vm1, %v417_v63 }
 0x702   :  { %654 = vmatpush.msra.mxu1 %v2025_v31  ;;  %697 = vmatpush.msra.mxu2 %v1958_v5 }
 0x703   :  { %631 = vmatpush.msra.mxu3 %v2020_v30 }
 0x704   :  { %655 = vmatpush.msra.mxu1 %v2045_v35  ;;  %698 = vmatpush.msra.mxu2 %v1964_v6 }
 0x705   :  { %632 = vmatpush.msra.mxu3 %v2032_v32 }
 0x706   :  { %656 = vmatpush.msra.mxu1 %v2050_v36 }
 0x708   :  { %657 = vmatpush.msra.mxu1 %v2060_v38 }
 0x77e   :  { %v437_v4 = vpop.f32.mrf.mxu1 }
 0x780   :  { %v412_v7 = vpop.f32.mrf.mxu3  ;;  %v478_v8 = vpop.f32.mrf.mxu2 }
 0x781   :  { %v438_v12 = vadd.f32 %v437_v4, %v412_v7  ;;  %v479_v14 = vadd.f32 %v478_v8, %v82_v1 }
 0x783   :  { %v440_v15 = vadd.f32 %v438_v12, %v2088_v48  ;;  %1825 = vtanh.f32 %v479_v14 }
 0x785   :  { %1827 = vtanh.f32 %v440_v15 }
 0x789   :  { %v1826_v16 = vpop.eup %1825 }
 0x78a   :  { %486 = vrot.lane.b32.xlu2 %v1826_v16, %s1911_s30  ;;  %v482_v18 = vmul.f32 0.5, %v1826_v16 }
 0x78b   :  { %v1828_v17 = vpop.eup %1827 }
 0x78c   :  { %446 = vrot.lane.b32.xlu0 %v1828_v17, %s1911_s30  ;;  %v483_v19 = vadd.f32 0.5, %v482_v18  ;;  %v442_v22 = vmul.f32 0.5, %v1828_v17 }
 0x78e   :  { %v443_v23 = vadd.f32 0.5, %v442_v22  ;;  %v484_v26 = vmul.f32 %v483_v19, %v383_v51 }
 0x790   :  { %v444_v34 = vmul.f32 %v443_v23, %v343_v55 }
 0x7e4   :  { %v487_v20 = vpop.permute.xlu2 %486 }
 0x7e5   :  { %v489_v21 = vmul.f32 %v487_v20, %v483_v19 }
 0x7e7   :  { %491 = vrot.lane.b32.xlu1 %v489_v21, %s1912_s4 }
 0x7fe   :  { %v447_v24 = vpop.permute.xlu0 %446 }
 0x7ff   :  { %v449_v25 = vmul.f32 %v447_v24, %v443_v23 }
 0x801   :  { %451 = vrot.lane.b32.xlu2 %v449_v25, %s1912_s4 }
 0x859   :  { %v492_v29 = vpop.permute.xlu1 %491 }
 0x85a   :  { %v494_v33 = vadd.f32 %v492_v29, %v484_v26 }
 0x85b   :  { %v452_v37 = vpop.permute.xlu2 %451 }
 0x85c   :  { %1829 = vtanh.f32 %v494_v33  ;;  %v454_v39 = vadd.f32 %v452_v37, %v444_v34 }
 0x85e   :  { %1831 = vtanh.f32 %v454_v39 }
 0x862   :  { %v1830_v42 = vpop.eup %1829 }
 0x863   :  { %497 = vrot.lane.b32.xlu0 %v1830_v42, %s1911_s30 }
 0x864   :  { %v1832_v43 = vpop.eup %1831 }
 0x865   :  { %457 = vrot.lane.b32.xlu1 %v1832_v43, %s1911_s30 }
 0x8d5   :  { %v498_v44 = vpop.permute.xlu0 %497 }
 0x8d6   :  { %v500_v45 = vmul.f32 %v498_v44, %v483_v19 }
 0x8d7   :  { %v458_v46 = vpop.permute.xlu1 %457 }
 0x8d8   :  { %v460_v47 = vmul.f32 %v458_v46, %v443_v23  ;;  %502 = vrot.lane.b32.xlu2 %v500_v45, %s1912_s4 }
 0x8da   :  { %527 = vrot.lane.b32.xlu0 %v460_v47, %s1912_s4 }
 0x932   :  { %v503_v50 = vpop.permute.xlu2 %502 }
 0x933   :  { %1762 = vmatmul.msk.f32.vlgmr.msrb.gmra.mxu3 %vm129_vm1, %v503_v50  ;;  %1764 = vmatmul.msk.f32.vlgmr.msrb.gmra.mxu2 %vm129_vm1, %v503_v50 }
 0x934   :  { %806 = vmatpush.msrb.mxu2 %v1942_v2  ;;  %740 = vmatpush.msrb.mxu3 %v2005_v27 }
 0x936   :  { %807 = vmatpush.msrb.mxu2 %v1948_v3  ;;  %741 = vmatpush.msrb.mxu3 %v2010_v28 }
 0x938   :  { %808 = vmatpush.msrb.mxu2 %v1958_v5  ;;  %742 = vmatpush.msrb.mxu3 %v2020_v30 }
 0x93a   :  { %809 = vmatpush.msrb.mxu2 %v1964_v6  ;;  %743 = vmatpush.msrb.mxu3 %v2032_v32 }
 0x94c   :  { %v528_v51 = vpop.permute.xlu0 %527 }
 0x94d   :  { %1763 = vmatmul.msk.f32.vlgmr.msrb.gmra.mxu1 %vm129_vm1, %v528_v51 }
 0x94e   :  { %765 = vmatpush.msrb.mxu1 %v2025_v31 }
 0x950   :  { %766 = vmatpush.msrb.mxu1 %v2045_v35 }
 0x952   :  { %767 = vmatpush.msrb.mxu1 %v2050_v36 }
 0x954   :  { %768 = vmatpush.msrb.mxu1 %v2060_v38 }
 0x9b6   :  { %v589_v54 = vpop.f32.mrf.mxu2  ;;  %v523_v57 = vpop.f32.mrf.mxu3 }
 0x9b7   :  { %v590_v55 = vadd.f32 %v589_v54, %v85_v53 }
 0x9b9   :  { %1833 = vtanh.f32 %v590_v55 }
 0x9bf   :  { %v1834_v56 = vpop.eup %1833 }
 0x9c0   :  { %597 = vrot.lane.b32.xlu1 %v1834_v56, %s1911_s30  ;;  %v593_v63 = vmul.f32 0.5, %v1834_v56 }
 0x9c2   :  { %v594_v7 = vadd.f32 0.5, %v593_v63 }
 0x9c4   :  { %v595_v17 = vmul.f32 %v594_v7, %v494_v33 }
 0x9ca   :  { %v548_v58 = vpop.f32.mrf.mxu1 }
 0x9cb   :  { %v549_v59 = vadd.f32 %v548_v58, %v523_v57 }
 0x9cd   :  { %v551_v60 = vadd.f32 %v549_v59, %v2088_v48 }
 0x9cf   :  { %1835 = vtanh.f32 %v551_v60 }
 0x9d5   :  { %v1836_v61 = vpop.eup %1835 }
 0x9d6   :  { %557 = vrot.lane.b32.xlu2 %v1836_v61, %s1911_s30  ;;  %v553_v62 = vmul.f32 0.5, %v1836_v61 }
 0x9d8   :  { %v554_v0 = vadd.f32 0.5, %v553_v62 }
 0x9da   :  { %v555_v14 = vmul.f32 %v554_v0, %v454_v39 }
 0xa30   :  { %v558_v1 = vpop.permute.xlu2 %557 }
 0xa31   :  { %v560_v4 = vmul.f32 %v558_v1, %v554_v0  ;;  %v91_v1 = vadd.f32 %v1980_v9, %v1990_v13 }
 0xa32   :  { %v598_v8 = vpop.permute.xlu1 %597 }
 0xa33   :  { %v600_v12 = vmul.f32 %v598_v8, %v594_v7  ;;  %562 = vrot.lane.b32.xlu1 %v560_v4, %s1912_s4 }
 0xa35   :  { %602 = vrot.lane.b32.xlu0 %v600_v12, %s1912_s4 }
 0xaa5   :  { %v563_v15 = vpop.permute.xlu1 %562 }
 0xaa6   :  { %v565_v16 = vadd.f32 %v563_v15, %v555_v14 }
 0xaa7   :  { %v603_v18 = vpop.permute.xlu0 %602 }
 0xaa8   :  { %1837 = vtanh.f32 %v565_v16  ;;  %v605_v19 = vadd.f32 %v603_v18, %v595_v17 }
 0xaaa   :  { %1839 = vtanh.f32 %v605_v19 }
 0xaae   :  { %v1838_v20 = vpop.eup %1837 }
 0xaaf   :  { %568 = vrot.lane.b32.xlu0 %v1838_v20, %s1911_s30 }
 0xab0   :  { %v1840_v21 = vpop.eup %1839 }
 0xab1   :  { %608 = vrot.lane.b32.xlu2 %v1840_v21, %s1911_s30 }
 0xb0b   :  { %v609_v22 = vpop.permute.xlu2 %608 }
 0xb0c   :  { %v611_v23 = vmul.f32 %v609_v22, %v594_v7 }
 0xb0e   :  { %613 = vrot.lane.b32.xlu1 %v611_v23, %s1912_s4 }
 0xb21   :  { %v569_v24 = vpop.permute.xlu0 %568 }
 0xb22   :  { %v571_v25 = vmul.f32 %v569_v24, %v554_v0 }
 0xb24   :  { %638 = vrot.lane.b32.xlu2 %v571_v25, %s1912_s4 }
 0xb7e   :  { %v639_v26 = vpop.permute.xlu2 %638 }
 0xb7f   :  { %1766 = vmatmul.msk.f32.vlgmr.msra.gmra.mxu1 %vm129_vm1, %v639_v26 }
 0xb80   :  { %v614_v29 = vpop.permute.xlu1 %613  ;;  %876 = vmatpush.msra.mxu1 %v2025_v31 }
 0xb81   :  { %1765 = vmatmul.msk.f32.vlgmr.msra.gmra.mxu3 %vm129_vm1, %v614_v29  ;;  %1767 = vmatmul.msk.f32.vlgmr.msra.gmra.mxu2 %vm129_vm1, %v614_v29 }
 0xb82   :  { %917 = vmatpush.msra.mxu2 %v1942_v2  ;;  %851 = vmatpush.msra.mxu3 %v2005_v27  ;;  %v88_v2 = vadd.f32 %v2082_v40, %v1990_v13 }
 0xb83   :  { %877 = vmatpush.msra.mxu1 %v2045_v35 }
 0xb84   :  { %918 = vmatpush.msra.mxu2 %v1948_v3  ;;  %852 = vmatpush.msra.mxu3 %v2010_v28 }
 0xb85   :  { %878 = vmatpush.msra.mxu1 %v2050_v36 }
 0xb86   :  { %919 = vmatpush.msra.mxu2 %v1958_v5  ;;  %853 = vmatpush.msra.mxu3 %v2020_v30 }
 0xb87   :  { %879 = vmatpush.msra.mxu1 %v2060_v38 }
 0xb88   :  { %920 = vmatpush.msra.mxu2 %v1964_v6  ;;  %854 = vmatpush.msra.mxu3 %v2032_v32 }
 0xbfc   :  { %v659_v33 = vpop.f32.mrf.mxu1 }
 0xc04   :  { %v634_v34 = vpop.f32.mrf.mxu3  ;;  %v700_v3 = vpop.f32.mrf.mxu2 }
 0xc05   :  { %v660_v37 = vadd.f32 %v659_v33, %v634_v34  ;;  %v701_v39 = vadd.f32 %v700_v3, %v88_v2 }
 0xc07   :  { %v662_v42 = vadd.f32 %v660_v37, %v2088_v48  ;;  %1841 = vtanh.f32 %v701_v39 }
 0xc09   :  { %1843 = vtanh.f32 %v662_v42 }
 0xc0d   :  { %v1842_v5 = vpop.eup %1841 }
 0xc0e   :  { %708 = vrot.lane.b32.xlu0 %v1842_v5, %s1911_s30  ;;  %v704_v6 = vmul.f32 0.5, %v1842_v5  ;;  %v94_v5 = vadd.f32 %v1987_v11, %v1990_v13 }
 0xc0f   :  { %v1844_v43 = vpop.eup %1843 }
 0xc10   :  { %668 = vrot.lane.b32.xlu1 %v1844_v43, %s1911_s30  ;;  %v664_v44 = vmul.f32 0.5, %v1844_v43  ;;  %v705_v45 = vadd.f32 0.5, %v704_v6 }
 0xc12   :  { %v665_v47 = vadd.f32 0.5, %v664_v44  ;;  %v706_v51 = vmul.f32 %v705_v45, %v605_v19 }
 0xc14   :  { %v666_v55 = vmul.f32 %v665_v47, %v565_v16 }
 0xc80   :  { %v709_v46 = vpop.permute.xlu0 %708 }
 0xc81   :  { %v711_v40 = vmul.f32 %v709_v46, %v705_v45 }
 0xc82   :  { %v669_v49 = vpop.permute.xlu1 %668 }
 0xc83   :  { %v671_v50 = vmul.f32 %v669_v49, %v665_v47  ;;  %713 = vrot.lane.b32.xlu2 %v711_v40, %s1912_s4 }
 0xc85   :  { %673 = vrot.lane.b32.xlu0 %v671_v50, %s1912_s4 }
 0xcdd   :  { %v714_v52 = vpop.permute.xlu2 %713 }
 0xcde   :  { %v716_v53 = vadd.f32 %v714_v52, %v706_v51 }
 0xce0   :  { %1845 = vtanh.f32 %v716_v53 }
 0xce6   :  { %v1846_v54 = vpop.eup %1845 }
 0xce7   :  { %719 = vrot.lane.b32.xlu1 %v1846_v54, %s1911_s30 }
 0xcf7   :  { %v674_v56 = vpop.permute.xlu0 %673 }
 0xcf8   :  { %v676_v57 = vadd.f32 %v674_v56, %v666_v55 }
 0xcfa   :  { %1847 = vtanh.f32 %v676_v57 }
 0xd00   :  { %v1848_v58 = vpop.eup %1847 }
 0xd01   :  { %679 = vrot.lane.b32.xlu2 %v1848_v58, %s1911_s30 }
 0xd59   :  { %v720_v59 = vpop.permute.xlu1 %719 }
 0xd5a   :  { %v722_v60 = vmul.f32 %v720_v59, %v705_v45 }
 0xd5b   :  { %v680_v61 = vpop.permute.xlu2 %679 }
 0xd5c   :  { %v682_v62 = vmul.f32 %v680_v61, %v665_v47  ;;  %724 = vrot.lane.b32.xlu0 %v722_v60, %s1912_s4  ;;  %v2250_v60 = vld [vmem:[%s2555_s1 + $0x88] sm:$0xff]  ;;  %v2255_v61 = vld [vmem:[%s2555_s1 + $0x80] sm:$0xff] }
 0xd5e   :  { %749 = vrot.lane.b32.xlu1 %v682_v62, %s1912_s4  ;;  %v2261_v62 = vld [vmem:[%s2555_s1 + $0x78] sm:$0xff] }
 0xdce   :  { %v725_v63 = vpop.permute.xlu0 %724 }
 0xdcf   :  { %1768 = vmatmul.msk.f32.vlgmr.msrb.gmra.mxu3 %vm129_vm1, %v725_v63  ;;  %1770 = vmatmul.msk.f32.vlgmr.msrb.gmra.mxu2 %vm129_vm1, %v725_v63 }
 0xdd0   :  { %v750_v0 = vpop.permute.xlu1 %749  ;;  %962 = vmatpush.msrb.mxu3 %v2005_v27 }
 0xdd1   :  { %1769 = vmatmul.msk.f32.vlgmr.msrb.gmra.mxu1 %vm129_vm1, %v750_v0 }
 0xdd2   :  { %963 = vmatpush.msrb.mxu3 %v2010_v28  ;;  %1044 = vmatpush.msrb.mxu1 %v2250_v60 }
 0xdd4   :  { %964 = vmatpush.msrb.mxu3 %v2020_v30  ;;  %1045 = vmatpush.msrb.mxu1 %v2255_v61 }
 0xdd6   :  { %965 = vmatpush.msrb.mxu3 %v2032_v32  ;;  %1046 = vmatpush.msrb.mxu1 %v2261_v62 }
 0xe4e   :  { %v770_v4 = vpop.f32.mrf.mxu1 }
 0xe52   :  { %v745_v7 = vpop.f32.mrf.mxu3  ;;  %v811_v8 = vpop.f32.mrf.mxu2 }
 0xe53   :  { %v771_v12 = vadd.f32 %v770_v4, %v745_v7  ;;  %v812_v14 = vadd.f32 %v811_v8, %v91_v1  ;;  %v2270_v7 = vld [vmem:[%s2555_s1 + $0x70] sm:$0xff] }
 0xe54   :  { %1047 = vmatpush.msrb.mxu1 %v2270_v7 }
 0xe55   :  { %v773_v15 = vadd.f32 %v771_v12, %v2088_v48  ;;  %1849 = vtanh.f32 %v812_v14  ;;  %v17_v14 = vperm.slane %v1985_v10, 2 }
 0xe57   :  { %1851 = vtanh.f32 %v773_v15  ;;  %v115_v15 = vadd.f32 %v2084_v41, %v17_v14 }
 0xe5b   :  { %v1850_v27 = vpop.eup %1849 }
 0xe5c   :  { %819 = vrot.lane.b32.xlu2 %v1850_v27, %s1911_s30  ;;  %v815_v30 = vmul.f32 0.5, %v1850_v27 }
 0xe5d   :  { %v1852_v28 = vpop.eup %1851 }
 0xe5e   :  { %779 = vrot.lane.b32.xlu0 %v1852_v28, %s1911_s30  ;;  %v816_v32 = vadd.f32 0.5, %v815_v30  ;;  %v775_v9 = vmul.f32 0.5, %v1852_v28 }
 0xe60   :  { %v776_v18 = vadd.f32 0.5, %v775_v9  ;;  %v817_v21 = vmul.f32 %v816_v32, %v716_v53 }
 0xe62   :  { %v777_v24 = vmul.f32 %v776_v18, %v676_v57 }
 0xeb6   :  { %v820_v16 = vpop.permute.xlu2 %819 }
 0xeb7   :  { %v822_v17 = vmul.f32 %v820_v16, %v816_v32 }
 0xeb9   :  { %824 = vrot.lane.b32.xlu1 %v822_v17, %s1912_s4 }
 0xed0   :  { %v780_v19 = vpop.permute.xlu0 %779 }
 0xed1   :  { %v782_v20 = vmul.f32 %v780_v19, %v776_v18 }
 0xed3   :  { %784 = vrot.lane.b32.xlu2 %v782_v20, %s1912_s4 }
 0xf2b   :  { %v825_v22 = vpop.permute.xlu1 %824 }
 0xf2c   :  { %v827_v23 = vadd.f32 %v825_v22, %v817_v21 }
 0xf2d   :  { %v785_v25 = vpop.permute.xlu2 %784 }
 0xf2e   :  { %1853 = vtanh.f32 %v827_v23  ;;  %v787_v26 = vadd.f32 %v785_v25, %v777_v24 }
 0xf30   :  { %1855 = vtanh.f32 %v787_v26 }
 0xf34   :  { %v1854_v29 = vpop.eup %1853 }
 0xf35   :  { %830 = vrot.lane.b32.xlu0 %v1854_v29, %s1911_s30 }
 0xf36   :  { %v1856_v2 = vpop.eup %1855 }
 0xf37   :  { %790 = vrot.lane.b32.xlu1 %v1856_v2, %s1911_s30 }
 0xfa7   :  { %v831_v33 = vpop.permute.xlu0 %830 }
 0xfa8   :  { %v833_v34 = vmul.f32 %v831_v33, %v816_v32 }
 0xfa9   :  { %v791_v3 = vpop.permute.xlu1 %790 }
 0xfaa   :  { %v793_v37 = vmul.f32 %v791_v3, %v776_v18  ;;  %835 = vrot.lane.b32.xlu2 %v833_v34, %s1912_s4 }
 0xfac   :  { %860 = vrot.lane.b32.xlu0 %v793_v37, %s1912_s4  ;;  %v2302_v37 = vld [vmem:[%s2555_s1 + $0xa8] sm:$0xff] }
 0xfad   :  { %1089 = vmatpush.msrb.mxu2 %v2302_v37 }
0x1004   :  { %v836_v39 = vpop.permute.xlu2 %835 }
0x1005   :  { %1771 = vmatmul.msk.f32.vlgmr.msra.gmra.mxu3 %vm129_vm1, %v836_v39  ;;  %1773 = vmatmul.msk.f32.vlgmr.msra.gmra.mxu2 %vm129_vm1, %v836_v39  ;;  %v2307_v39 = vld [vmem:[%s2555_s1 + $0xa0] sm:$0xff] }
0x1006   :  { %987 = vmatpush.msra.mxu3 %v2025_v31  ;;  %1090 = vmatpush.msrb.mxu2 %v2307_v39 }
0x1008   :  { %988 = vmatpush.msra.mxu3 %v2045_v35 }
0x100a   :  { %989 = vmatpush.msra.mxu3 %v2050_v36 }
0x100c   :  { %990 = vmatpush.msra.mxu3 %v2060_v38 }
0x101e   :  { %v861_v42 = vpop.permute.xlu0 %860 }
0x101f   :  { %1772 = vmatmul.msk.f32.vlgmr.msra.gmra.mxu1 %vm129_vm1, %v861_v42  ;;  %v2313_v42 = vld [vmem:[%s2555_s1 + $0x98] sm:$0xff] }
0x1020   :  { %1182 = vmatpush.msra.mxu1 %v2250_v60  ;;  %1091 = vmatpush.msrb.mxu2 %v2313_v42 }
0x1022   :  { %1183 = vmatpush.msra.mxu1 %v2255_v61 }
0x1024   :  { %1184 = vmatpush.msra.mxu1 %v2261_v62 }
0x1026   :  { %1185 = vmatpush.msra.mxu1 %v2270_v7 }
0x1088   :  { %v922_v43 = vpop.f32.mrf.mxu2  ;;  %v856_v45 = vpop.f32.mrf.mxu3 }
0x1089   :  { %v923_v6 = vadd.f32 %v922_v43, %v94_v5  ;;  %v2319_v5 = vld [vmem:[%s2555_s1 + $0x90] sm:$0xff] }
0x108a   :  { %1092 = vmatpush.msrb.mxu2 %v2319_v5 }
0x108b   :  { %1857 = vtanh.f32 %v923_v6 }
0x108c   :  { %1227 = vmatpush.msra.mxu2 %v2302_v37 }
0x108e   :  { %1228 = vmatpush.msra.mxu2 %v2307_v39 }
0x1090   :  { %1229 = vmatpush.msra.mxu2 %v2313_v42 }
0x1091   :  { %v1858_v44 = vpop.eup %1857 }
0x1092   :  { %930 = vrot.lane.b32.xlu1 %v1858_v44, %s1911_s30  ;;  %v926_v40 = vmul.f32 0.5, %v1858_v44  ;;  %1230 = vmatpush.msra.mxu2 %v2319_v5 }
0x1094   :  { %v927_v13 = vadd.f32 0.5, %v926_v40 }
0x1096   :  { %v928_v55 = vmul.f32 %v927_v13, %v827_v23 }
0x109c   :  { %v881_v31 = vpop.f32.mrf.mxu1 }
0x109d   :  { %v882_v46 = vadd.f32 %v881_v31, %v856_v45  ;;  %v2332_v31 = vld [vmem:[%s2555_s1 + $0xc8] sm:$0xff] }
0x109f   :  { %v884_v35 = vadd.f32 %v882_v46, %v2088_v48  ;;  %v2337_v46 = vld [vmem:[%s2555_s1 + $0xc0] sm:$0xff] }
0x10a1   :  { %1859 = vtanh.f32 %v884_v35  ;;  %v2343_v35 = vld [vmem:[%s2555_s1 + $0xb8] sm:$0xff] }
0x10a7   :  { %v1860_v36 = vpop.eup %1859 }
0x10a8   :  { %890 = vrot.lane.b32.xlu2 %v1860_v36, %s1911_s30  ;;  %v886_v38 = vmul.f32 0.5, %v1860_v36  ;;  %v2349_v36 = vld [vmem:[%s2555_s1 + $0xb0] sm:$0xff] }
0x10aa   :  { %v887_v47 = vadd.f32 0.5, %v886_v38 }
0x10ac   :  { %v888_v52 = vmul.f32 %v887_v47, %v787_v26 }
0x1102   :  { %v891_v49 = vpop.permute.xlu2 %890 }
0x1103   :  { %v893_v11 = vmul.f32 %v891_v49, %v887_v47 }
0x1104   :  { %v931_v50 = vpop.permute.xlu1 %930 }
0x1105   :  { %v933_v51 = vmul.f32 %v931_v50, %v927_v13  ;;  %895 = vrot.lane.b32.xlu1 %v893_v11, %s1912_s4 }
0x1107   :  { %935 = vrot.lane.b32.xlu0 %v933_v51, %s1912_s4 }
0x1177   :  { %v896_v53 = vpop.permute.xlu1 %895 }
0x1178   :  { %v898_v54 = vadd.f32 %v896_v53, %v888_v52 }
0x1179   :  { %v936_v56 = vpop.permute.xlu0 %935 }
0x117a   :  { %1861 = vtanh.f32 %v898_v54  ;;  %v938_v57 = vadd.f32 %v936_v56, %v928_v55 }
0x117c   :  { %1863 = vtanh.f32 %v938_v57 }
0x1180   :  { %v1862_v58 = vpop.eup %1861 }
0x1181   :  { %901 = vrot.lane.b32.xlu0 %v1862_v58, %s1911_s30 }
0x1182   :  { %v1864_v59 = vpop.eup %1863 }
0x1183   :  { %941 = vrot.lane.b32.xlu2 %v1864_v59, %s1911_s30 }
0x11dd   :  { %v942_v63 = vpop.permute.xlu2 %941 }
0x11de   :  { %v944_v0 = vmul.f32 %v942_v63, %v927_v13 }
0x11e0   :  { %946 = vrot.lane.b32.xlu1 %v944_v0, %s1912_s4  ;;  %v2391_v0 = vld [vmem:[%s2555_s1 + $0xe8] sm:$0xff] }
0x11e1   :  { %1162 = vmatpush.msrb.mxu0 %v2391_v0 }
0x11f3   :  { %v902_v1 = vpop.permute.xlu0 %901 }
0x11f4   :  { %v904_v4 = vmul.f32 %v902_v1, %v887_v47  ;;  %v2375_v47 = vld [vmem:[%s2557_s2] sm:$0xff] }
0x11f5   :  { %v2378_v49 = vperm.slane %v2375_v47, 4  ;;  %v2396_v1 = vld [vmem:[%s2555_s1 + $0xe0] sm:$0xff] }
0x11f6   :  { %971 = vrot.lane.b32.xlu2 %v904_v4, %s1912_s4  ;;  %v2402_v4 = vld [vmem:[%s2555_s1 + $0xd8] sm:$0xff]  ;;  %1163 = vmatpush.msrb.mxu0 %v2396_v1 }
0x11f8   :  { %1164 = vmatpush.msrb.mxu0 %v2402_v4 }
0x1250   :  { %v972_v12 = vpop.permute.xlu2 %971 }
0x1252   :  { %v947_v8 = vpop.permute.xlu1 %946 }
0x1253   :  { %1774 = vmatmul.msk.f32.vlgmr.msrb.gmra.mxu3 %vm129_vm1, %v947_v8  ;;  %1776 = vmatmul.msk.f32.vlgmr.msrb.gmra.mxu1 %vm129_vm1, %v947_v8  ;;  %v2408_v8 = vld [vmem:[%s2555_s1 + $0xd0] sm:$0xff] }
0x1254   :  { %1315 = vmatpush.msrb.mxu1 %v2250_v60  ;;  %1114 = vmatpush.msrb.mxu3 %v2332_v31 }
0x1255   :  { %1165 = vmatpush.msrb.mxu0 %v2408_v8 }
0x1256   :  { %1316 = vmatpush.msrb.mxu1 %v2255_v61  ;;  %1115 = vmatpush.msrb.mxu3 %v2337_v46 }
0x1257   :  { %1295 = vmatpush.msra.mxu0 %v2391_v0 }
0x1258   :  { %1317 = vmatpush.msrb.mxu1 %v2261_v62  ;;  %1116 = vmatpush.msrb.mxu3 %v2343_v35 }
0x1259   :  { %1296 = vmatpush.msra.mxu0 %v2396_v1 }
0x125a   :  { %1318 = vmatpush.msrb.mxu1 %v2270_v7  ;;  %1117 = vmatpush.msrb.mxu3 %v2349_v36 }
0x125b   :  { %1775 = vmatmul.msk.f32.vlgmr.msra.gmra.mxu3 %vm129_vm1, %v972_v12  ;;  %1297 = vmatpush.msra.mxu0 %v2402_v4 }
0x125c   :  { %1247 = vmatpush.msra.mxu3 %v2332_v31 }
0x125d   :  { %1298 = vmatpush.msra.mxu0 %v2408_v8 }
0x125e   :  { %1248 = vmatpush.msra.mxu3 %v2337_v46 }
0x1260   :  { %1249 = vmatpush.msra.mxu3 %v2343_v35 }
0x1262   :  { %1250 = vmatpush.msra.mxu3 %v2349_v36 }
0x12d0   :  { %v1049_v27 = vpop.f32.mrf.mxu1 }
0x12d1   :  { %v1050_v28 = vadd.f32 %v1049_v27, %v115_v15  ;;  %v2429_v27 = vperm.slane %v2375_v47, 3 }
0x12d3   :  { %1865 = vtanh.f32 %v1050_v28 }
0x12d6   :  { %v967_v30 = vpop.f32.mrf.mxu3 }
0x12d9   :  { %v1866_v32 = vpop.eup %1865 }
0x12da   :  { %1057 = vrot.lane.b32.xlu1 %v1866_v32, %s1911_s30  ;;  %v1053_v19 = vmul.f32 0.5, %v1866_v32 }
0x12dc   :  { %v1054_v20 = vadd.f32 0.5, %v1053_v19 }
0x12de   :  { %v992_v16 = vpop.f32.mrf.mxu3 }
0x12df   :  { %v993_v17 = vadd.f32 %v992_v16, %v967_v30 }
0x12e1   :  { %v995_v9 = vadd.f32 %v993_v17, %v2088_v48  ;;  %v1055_v48 = vmul.f32 %v1054_v20, %v938_v57 }
0x12e3   :  { %1867 = vtanh.f32 %v995_v9 }
0x12e9   :  { %v1868_v18 = vpop.eup %1867 }
0x12ea   :  { %1001 = vrot.lane.b32.xlu0 %v1868_v18, %s1911_s30  ;;  %v997_v41 = vmul.f32 0.5, %v1868_v18 }
0x12ec   :  { %v998_v22 = vadd.f32 0.5, %v997_v41 }
0x12ee   :  { %v999_v25 = vmul.f32 %v998_v22, %v898_v54 }
0x134c   :  { %v1058_v10 = vpop.permute.xlu1 %1057 }
0x134d   :  { %v1060_v21 = vmul.f32 %v1058_v10, %v1054_v20 }
0x134f   :  { %1062 = vrot.lane.b32.xlu0 %v1060_v21, %s1912_s4 }
0x135c   :  { %v1002_v23 = vpop.permute.xlu0 %1001 }
0x135d   :  { %v1004_v24 = vmul.f32 %v1002_v23, %v998_v22 }
0x135f   :  { %1006 = vrot.lane.b32.xlu2 %v1004_v24, %s1912_s4 }
0x13b9   :  { %v1007_v26 = vpop.permute.xlu2 %1006 }
0x13ba   :  { %v2291_v29 = vadd.f32 %v1007_v26, %v999_v25 }
0x13bc   :  { %1869 = vtanh.f32 %v2291_v29 }
0x13c1   :  { %v1063_v2 = vpop.permute.xlu0 %1062 }
0x13c2   :  { %v1870_v33 = vpop.eup %1869  ;;  %v2294_v34 = vadd.f32 %v1063_v2, %v1055_v48 }
0x13c3   :  { %1012 = vrot.lane.b32.xlu1 %v1870_v33, %s1911_s30 }
0x13c4   :  { %1871 = vtanh.f32 %v2294_v34 }
0x13ca   :  { %v1872_v3 = vpop.eup %1871 }
0x13cb   :  { %1068 = vrot.lane.b32.xlu2 %v1872_v3, %s1911_s30 }
0x1425   :  { %v1069_v43 = vpop.permute.xlu2 %1068 }
0x1426   :  { %v1071_v6 = vmul.f32 %v1069_v43, %v1054_v20 }
0x1428   :  { %1073 = vrot.lane.b32.xlu0 %v1071_v6, %s1912_s4 }
0x1435   :  { %v1013_v44 = vpop.permute.xlu1 %1012 }
0x1436   :  { %v1015_v45 = vmul.f32 %v1013_v44, %v998_v22 }
0x1438   :  { %1098 = vrot.lane.b32.xlu1 %v1015_v45, %s1912_s4 }
0x149a   :  { %v1074_v38 = vpop.permute.xlu0 %1073 }
0x149b   :  { %1777 = vmatmul.msk.f32.vlgmr.msrb.gmra.mxu2 %vm129_vm1, %v1074_v38  ;;  %1780 = vmatmul.msk.f32.vlgmr.msra.gmra.mxu1 %vm129_vm1, %v1074_v38 }
0x149c   :  { %1360 = vmatpush.msrb.mxu2 %v2302_v37  ;;  %1448 = vmatpush.msra.mxu1 %v2250_v60 }
0x149e   :  { %1361 = vmatpush.msrb.mxu2 %v2307_v39  ;;  %1449 = vmatpush.msra.mxu1 %v2255_v61 }
0x14a0   :  { %1362 = vmatpush.msrb.mxu2 %v2313_v42  ;;  %1450 = vmatpush.msra.mxu1 %v2261_v62 }
0x14a2   :  { %1363 = vmatpush.msrb.mxu2 %v2319_v5  ;;  %1451 = vmatpush.msra.mxu1 %v2270_v7 }
0x14aa   :  { %v1099_v40 = vpop.permute.xlu1 %1098 }
0x14ab   :  { %1778 = vmatmul.msk.f32.vlgmr.msrb.gmra.mxu3 %vm129_vm1, %v1099_v40 }
0x14ac   :  { %1380 = vmatpush.msrb.mxu3 %v2332_v31 }
0x14ae   :  { %1381 = vmatpush.msrb.mxu3 %v2337_v46 }
0x14b0   :  { %1382 = vmatpush.msrb.mxu3 %v2343_v35 }
0x14b2   :  { %1383 = vmatpush.msrb.mxu3 %v2349_v36 }
0x1518   :  { %v1187_v32 = vpop.f32.mrf.mxu1 }
0x151e   :  { %v1094_v11 = vpop.f32.mrf.mxu2 }
0x152e   :  { %v1119_v13 = vpop.f32.mrf.mxu3 }
0x152f   :  { %v1120_v50 = vadd.f32 %v1119_v13, %v1094_v11 }
0x1531   :  { %v1122_v51 = vadd.f32 %v1120_v50, %v2378_v49 }
0x1533   :  { %1873 = vtanh.f32 %v1122_v51 }
0x1539   :  { %v1874_v52 = vpop.eup %1873 }
0x153a   :  { %1128 = vrot.lane.b32.xlu2 %v1874_v52, %s1911_s30  ;;  %v1124_v53 = vmul.f32 0.5, %v1874_v52 }
0x153c   :  { %v1125_v54 = vadd.f32 0.5, %v1124_v53 }
0x153e   :  { %v1126_v57 = vmul.f32 %v1125_v54, %v2291_v29 }
0x1594   :  { %v1129_v55 = vpop.permute.xlu2 %1128 }
0x1595   :  { %v1131_v56 = vmul.f32 %v1129_v55, %v1125_v54 }
0x1597   :  { %1133 = vrot.lane.b32.xlu0 %v1131_v56, %s1912_s4 }
0x1609   :  { %v1134_v58 = vpop.permute.xlu0 %1133 }
0x160a   :  { %v2384_v59 = vadd.f32 %v1134_v58, %v1126_v57 }
0x160c   :  { %1875 = vtanh.f32 %v2384_v59 }
0x1612   :  { %v1876_v63 = vpop.eup %1875 }
0x1613   :  { %1139 = vrot.lane.b32.xlu1 %v1876_v63, %s1911_s30 }
0x1685   :  { %v1140_v12 = vpop.permute.xlu1 %1139 }
0x1686   :  { %v1142_v14 = vmul.f32 %v1140_v12, %v1125_v54 }
0x1688   :  { %1144 = vrot.lane.b32.xlu2 %v1142_v14, %s1912_s4 }
0x16e2   :  { %v1145_v15 = vpop.permute.xlu2 %1144 }
0x16e3   :  { %1147 = vst.msk [vmem:[#allocation2] sm:$0xff] %vm129_vm1, %v1145_v15  ;;  %1779 = vmatmul.msk.f32.vlgmr.msrb.gmra.mxu0 %vm129_vm1, %v1145_v15  ;;  %1782 = vmatmul.msk.f32.vlgmr.msra.gmra.mxu3 %vm129_vm1, %v1145_v15 }
0x16e4   :  { %1428 = vmatpush.msrb.mxu0 %v2391_v0  ;;  %1513 = vmatpush.msra.mxu3 %v2332_v31 }
0x16e6   :  { %1429 = vmatpush.msrb.mxu0 %v2396_v1  ;;  %1514 = vmatpush.msra.mxu3 %v2337_v46 }
0x16e8   :  { %1430 = vmatpush.msrb.mxu0 %v2402_v4  ;;  %1515 = vmatpush.msra.mxu3 %v2343_v35 }
0x16ea   :  { %1431 = vmatpush.msrb.mxu0 %v2408_v8  ;;  %1516 = vmatpush.msra.mxu3 %v2349_v36 }
0x1760   :  { %v1167_v28 = vpop.f32.mrf.mxu0 }
0x1761   :  { %v1168_v30 = vadd.f32 %v1167_v28, %v2429_v27 }
0x1763   :  { %v1188_v16 = vadd.f32 %v1187_v32, %v1168_v30 }
0x1765   :  { %1877 = vtanh.f32 %v1188_v16 }
0x1766   :  { %v1252_v26 = vpop.f32.mrf.mxu3 }
0x176b   :  { %v1878_v17 = vpop.eup %1877 }
0x176c   :  { %1195 = vrot.lane.b32.xlu0 %v1878_v17, %s1911_s30  ;;  %v1191_v9 = vmul.f32 0.5, %v1878_v17 }
0x176e   :  { %v1192_v18 = vadd.f32 0.5, %v1191_v9 }
0x1770   :  { %v1193_v10 = vmul.f32 %v1192_v18, %v2294_v34 }
0x17de   :  { %v1196_v19 = vpop.permute.xlu0 %1195 }
0x17df   :  { %v1198_v20 = vmul.f32 %v1196_v19, %v1192_v18 }
0x17e1   :  { %1200 = vrot.lane.b32.xlu1 %v1198_v20, %s1912_s4 }
0x1853   :  { %v1201_v21 = vpop.permute.xlu1 %1200 }
0x1854   :  { %v2435_v41 = vadd.f32 %v1201_v21, %v1193_v10 }
0x1856   :  { %1879 = vtanh.f32 %v2435_v41 }
0x185c   :  { %v1880_v22 = vpop.eup %1879 }
0x185d   :  { %1206 = vrot.lane.b32.xlu2 %v1880_v22, %s1911_s30 }
0x18b7   :  { %v1207_v23 = vpop.permute.xlu2 %1206 }
0x18b8   :  { %v1209_v24 = vmul.f32 %v1207_v23, %v1192_v18 }
0x18ba   :  { %1211 = vrot.lane.b32.xlu0 %v1209_v24, %s1912_s4 }
0x192c   :  { %v1212_v25 = vpop.permute.xlu0 %1211 }
0x192d   :  { %1781 = vmatmul.msk.f32.vlgmr.msra.gmra.mxu2 %vm129_vm1, %v1212_v25  ;;  %1784 = vmatmul.msk.f32.vlgmr.msrb.gmra.mxu1 %vm129_vm1, %v1212_v25 }
0x192e   :  { %1493 = vmatpush.msra.mxu2 %v2302_v37  ;;  %1581 = vmatpush.msrb.mxu1 %v2250_v60 }
0x1930   :  { %1494 = vmatpush.msra.mxu2 %v2307_v39  ;;  %1582 = vmatpush.msrb.mxu1 %v2255_v61 }
0x1932   :  { %1495 = vmatpush.msra.mxu2 %v2313_v42  ;;  %1583 = vmatpush.msrb.mxu1 %v2261_v62 }
0x1934   :  { %1496 = vmatpush.msra.mxu2 %v2319_v5  ;;  %1584 = vmatpush.msrb.mxu1 %v2270_v7 }
0x19aa   :  { %v1320_v13 = vpop.f32.mrf.mxu1 }
0x19b0   :  { %v1232_v29 = vpop.f32.mrf.mxu2 }
0x19b1   :  { %v1253_v48 = vadd.f32 %v1252_v26, %v1232_v29 }
0x19b3   :  { %v1255_v2 = vadd.f32 %v1253_v48, %v2378_v49 }
0x19b5   :  { %1881 = vtanh.f32 %v1255_v2 }
0x19bb   :  { %v1882_v33 = vpop.eup %1881 }
0x19bc   :  { %1261 = vrot.lane.b32.xlu1 %v1882_v33, %s1911_s30  ;;  %v1257_v60 = vmul.f32 0.5, %v1882_v33 }
0x19be   :  { %v1258_v34 = vadd.f32 0.5, %v1257_v60 }
0x19c0   :  { %v1259_v62 = vmul.f32 %v1258_v34, %v2384_v59 }
0x1a2e   :  { %v1262_v61 = vpop.permute.xlu1 %1261 }
0x1a2f   :  { %v1264_v3 = vmul.f32 %v1262_v61, %v1258_v34 }
0x1a31   :  { %1266 = vrot.lane.b32.xlu2 %v1264_v3, %s1912_s4 }
0x1a8b   :  { %v1267_v43 = vpop.permute.xlu2 %1266 }
0x1a8c   :  { %v1269_v6 = vadd.f32 %v1267_v43, %v1259_v62 }
0x1a8e   :  { %1883 = vtanh.f32 %v1269_v6 }
0x1a94   :  { %v1884_v7 = vpop.eup %1883 }
0x1a95   :  { %1272 = vrot.lane.b32.xlu0 %v1884_v7, %s1911_s30 }
0x1b07   :  { %v1273_v44 = vpop.permute.xlu0 %1272 }
0x1b08   :  { %v1275_v45 = vmul.f32 %v1273_v44, %v1258_v34 }
0x1b0a   :  { %1277 = vrot.lane.b32.xlu1 %v1275_v45, %s1912_s4 }
0x1b7c   :  { %v1278_v38 = vpop.permute.xlu1 %1277 }
0x1b7d   :  { %1280 = vst.msk [vmem:[#allocation2 + $0x8] sm:$0xff] %vm129_vm1, %v1278_v38  ;;  %1783 = vmatmul.msk.f32.vlgmr.msra.gmra.mxu0 %vm129_vm1, %v1278_v38  ;;  %1786 = vmatmul.msk.f32.vlgmr.msrb.gmra.mxu3 %vm129_vm1, %v1278_v38 }
0x1b7e   :  { %1561 = vmatpush.msra.mxu0 %v2391_v0  ;;  %1646 = vmatpush.msrb.mxu3 %v2332_v31 }
0x1b80   :  { %1562 = vmatpush.msra.mxu0 %v2396_v1  ;;  %1647 = vmatpush.msrb.mxu3 %v2337_v46 }
0x1b82   :  { %1563 = vmatpush.msra.mxu0 %v2402_v4  ;;  %1648 = vmatpush.msrb.mxu3 %v2343_v35 }
0x1b84   :  { %1564 = vmatpush.msra.mxu0 %v2408_v8  ;;  %1649 = vmatpush.msrb.mxu3 %v2349_v36 }
0x1bfa   :  { %v1300_v40 = vpop.f32.mrf.mxu0 }
0x1bfb   :  { %v1301_v11 = vadd.f32 %v1300_v40, %v2429_v27 }
0x1bfd   :  { %v1321_v50 = vadd.f32 %v1320_v13, %v1301_v11  ;;  %v1688_v13 = vld [vmem:[%s2555_s1 + $0x108] sm:$0xff] }
0x1bff   :  { %1885 = vtanh.f32 %v1321_v50  ;;  %v1687_v50 = vld [vmem:[%s2555_s1 + $0x100] sm:$0xff] }
0x1c00   :  { %v1385_v59 = vpop.f32.mrf.mxu3 }
0x1c05   :  { %v1886_v51 = vpop.eup %1885 }
0x1c06   :  { %1328 = vrot.lane.b32.xlu2 %v1886_v51, %s1911_s30  ;;  %v1324_v31 = vmul.f32 0.5, %v1886_v51  ;;  %v1686_v51 = vld [vmem:[%s2555_s1 + $0xf8] sm:$0xff] }
0x1c08   :  { %v1325_v52 = vadd.f32 0.5, %v1324_v31  ;;  %v1685_v31 = vld [vmem:[%s2555_s1 + $0xf0] sm:$0xff] }
0x1c0a   :  { %v1326_v35 = vmul.f32 %v1325_v52, %v2435_v41 }
0x1c60   :  { %v1329_v46 = vpop.permute.xlu2 %1328 }
0x1c61   :  { %v1331_v53 = vmul.f32 %v1329_v46, %v1325_v52  ;;  %v1680_v46 = vld [vmem:[#allocation2] sm:$0xff] }
0x1c63   :  { %1333 = vrot.lane.b32.xlu0 %v1331_v53, %s1912_s4  ;;  %v1681_v53 = vld [vmem:[#allocation2 + $0x8] sm:$0xff] }
0x1cd5   :  { %v1334_v54 = vpop.permute.xlu0 %1333 }
0x1cd6   :  { %v1336_v55 = vadd.f32 %v1334_v54, %v1326_v35 }
0x1cd8   :  { %1887 = vtanh.f32 %v1336_v55 }
0x1cde   :  { %v1888_v36 = vpop.eup %1887 }
0x1cdf   :  { %1339 = vrot.lane.b32.xlu1 %v1888_v36, %s1911_s30 }
0x1d51   :  { %v1340_v56 = vpop.permute.xlu1 %1339 }
0x1d52   :  { %v1342_v57 = vmul.f32 %v1340_v56, %v1325_v52 }
0x1d54   :  { %1344 = vrot.lane.b32.xlu2 %v1342_v57, %s1912_s4 }
0x1dae   :  { %v1345_v58 = vpop.permute.xlu2 %1344 }
0x1daf   :  { %1785 = vmatmul.msk.f32.vlgmr.msrb.gmra.mxu2 %vm129_vm1, %v1345_v58  ;;  %1788 = vmatmul.msk.f32.vlgmr.msra.gmra.mxu1 %vm129_vm1, %v1345_v58  ;;  %v20_v58 = vperm.slane %v2375_v47, 5 }
0x1db0   :  { %1626 = vmatpush.msrb.mxu2 %v2302_v37 }
0x1db2   :  { %1627 = vmatpush.msrb.mxu2 %v2307_v39 }
0x1db4   :  { %1628 = vmatpush.msrb.mxu2 %v2313_v42 }
0x1db6   :  { %1629 = vmatpush.msrb.mxu2 %v2319_v5 }
0x1e2c   :  { %v1453_v9 = vpop.f32.mrf.mxu1 }
0x1e32   :  { %v1365_v63 = vpop.f32.mrf.mxu2 }
0x1e33   :  { %v1386_v0 = vadd.f32 %v1385_v59, %v1365_v63 }
0x1e35   :  { %v1388_v1 = vadd.f32 %v1386_v0, %v2378_v49 }
0x1e37   :  { %1889 = vtanh.f32 %v1388_v1 }
0x1e3d   :  { %v1890_v4 = vpop.eup %1889 }
0x1e3e   :  { %1394 = vrot.lane.b32.xlu0 %v1890_v4, %s1911_s30  ;;  %v1390_v8 = vmul.f32 0.5, %v1890_v4 }
0x1e40   :  { %v1391_v12 = vadd.f32 0.5, %v1390_v8 }
0x1e42   :  { %v1392_v37 = vmul.f32 %v1391_v12, %v1269_v6 }
0x1eb0   :  { %v1395_v14 = vpop.permute.xlu0 %1394 }
0x1eb1   :  { %v1397_v15 = vmul.f32 %v1395_v14, %v1391_v12 }
0x1eb3   :  { %1399 = vrot.lane.b32.xlu1 %v1397_v15, %s1912_s4 }
0x1f25   :  { %v1400_v39 = vpop.permute.xlu1 %1399 }
0x1f26   :  { %v1402_v42 = vadd.f32 %v1400_v39, %v1392_v37 }
0x1f28   :  { %1891 = vtanh.f32 %v1402_v42 }
0x1f2e   :  { %v1892_v5 = vpop.eup %1891 }
0x1f2f   :  { %1405 = vrot.lane.b32.xlu2 %v1892_v5, %s1911_s30 }
0x1f89   :  { %v1406_v28 = vpop.permute.xlu2 %1405 }
0x1f8a   :  { %v1408_v30 = vmul.f32 %v1406_v28, %v1391_v12 }
0x1f8c   :  { %1410 = vrot.lane.b32.xlu0 %v1408_v30, %s1912_s4 }
0x1ffe   :  { %v1411_v32 = vpop.permute.xlu0 %1410 }
0x1fff   :  { %1413 = vst.msk [vmem:[#allocation2 + $0x10] sm:$0xff] %vm129_vm1, %v1411_v32  ;;  %1787 = vmatmul.msk.f32.vlgmr.msrb.gmra.mxu0 %vm129_vm1, %v1411_v32  ;;  %1790 = vmatmul.msk.f32.vlgmr.msra.gmra.mxu3 %vm129_vm1, %v1411_v32 }
0x2000   :  { %1716 = vmatpush.msrb.mxu0 %v1688_v13 }
0x2002   :  { %1717 = vmatpush.msrb.mxu0 %v1687_v50 }
0x2004   :  { %1718 = vmatpush.msrb.mxu0 %v1686_v51 }
0x2006   :  { %1719 = vmatpush.msrb.mxu0 %v1685_v31  ;;  %v1682_v35 = vld [vmem:[#allocation2 + $0x10] sm:$0xff] }
0x207c   :  { %v1433_v16 = vpop.f32.mrf.mxu0 }
0x207d   :  { %v1434_v17 = vadd.f32 %v1433_v16, %v2429_v27 }
0x207f   :  { %v1454_v18 = vadd.f32 %v1453_v9, %v1434_v17 }
0x2081   :  { %1893 = vtanh.f32 %v1454_v18 }
0x2082   :  { %v1518_v2 = vpop.f32.mrf.mxu3 }
0x2087   :  { %v1894_v19 = vpop.eup %1893 }
0x2088   :  { %1461 = vrot.lane.b32.xlu1 %v1894_v19, %s1911_s30  ;;  %v1457_v20 = vmul.f32 0.5, %v1894_v19 }
0x208a   :  { %v1458_v10 = vadd.f32 0.5, %v1457_v20 }
0x208c   :  { %v1459_v22 = vmul.f32 %v1458_v10, %v1336_v55 }
0x20fa   :  { %v1462_v21 = vpop.permute.xlu1 %1461 }
0x20fb   :  { %v1464_v41 = vmul.f32 %v1462_v21, %v1458_v10 }
0x20fd   :  { %1466 = vrot.lane.b32.xlu2 %v1464_v41, %s1912_s4 }
0x2157   :  { %v1467_v23 = vpop.permute.xlu2 %1466 }
0x2158   :  { %v2490_v24 = vadd.f32 %v1467_v23, %v1459_v22 }
0x215a   :  { %1895 = vtanh.f32 %v2490_v24 }
0x2160   :  { %v1896_v25 = vpop.eup %1895 }
0x2161   :  { %1472 = vrot.lane.b32.xlu0 %v1896_v25, %s1911_s30 }
0x21d3   :  { %v1473_v26 = vpop.permute.xlu0 %1472 }
0x21d4   :  { %v1475_v29 = vmul.f32 %v1473_v26, %v1458_v10 }
0x21d6   :  { %1477 = vrot.lane.b32.xlu1 %v1475_v29, %s1912_s4 }
0x2248   :  { %v1478_v48 = vpop.permute.xlu1 %1477 }
0x2249   :  { %1789 = vmatmul.msk.f32.vlgmr.msra.gmra.mxu2 %vm129_vm1, %v1478_v48  ;;  %1792 = vmatmul.msk.f32.vlgmr.msrb.gmra.mxu1 %vm129_vm1, %v1478_v48 }
0x22c6   :  { %v1586_v56 = vpop.f32.mrf.mxu1 }
0x22cc   :  { %v1498_v33 = vpop.f32.mrf.mxu2 }
0x22cd   :  { %v1519_v60 = vadd.f32 %v1518_v2, %v1498_v33 }
0x22cf   :  { %v1521_v34 = vadd.f32 %v1519_v60, %v2378_v49 }
0x22d1   :  { %1897 = vtanh.f32 %v1521_v34 }
0x22d7   :  { %v1898_v61 = vpop.eup %1897 }
0x22d8   :  { %1527 = vrot.lane.b32.xlu2 %v1898_v61, %s1911_s30  ;;  %v1523_v3 = vmul.f32 0.5, %v1898_v61 }
0x22da   :  { %v1524_v62 = vadd.f32 0.5, %v1523_v3 }
0x22dc   :  { %v1525_v7 = vmul.f32 %v1524_v62, %v1402_v42 }
0x2332   :  { %v1528_v43 = vpop.permute.xlu2 %1527 }
0x2333   :  { %v1530_v6 = vmul.f32 %v1528_v43, %v1524_v62 }
0x2335   :  { %1532 = vrot.lane.b32.xlu0 %v1530_v6, %s1912_s4 }
0x23a7   :  { %v1533_v44 = vpop.permute.xlu0 %1532 }
0x23a8   :  { %v2500_v45 = vadd.f32 %v1533_v44, %v1525_v7 }
0x23aa   :  { %1899 = vtanh.f32 %v2500_v45 }
0x23b0   :  { %v1900_v38 = vpop.eup %1899 }
0x23b1   :  { %1538 = vrot.lane.b32.xlu1 %v1900_v38, %s1911_s30 }
0x2423   :  { %v1539_v40 = vpop.permute.xlu1 %1538 }
0x2424   :  { %v1541_v11 = vmul.f32 %v1539_v40, %v1524_v62 }
0x2426   :  { %1543 = vrot.lane.b32.xlu2 %v1541_v11, %s1912_s4 }
0x2480   :  { %v1544_v52 = vpop.permute.xlu2 %1543 }
0x2481   :  { %1546 = vst.msk [vmem:[#allocation2 + $0x18] sm:$0xff] %vm129_vm1, %v1544_v52  ;;  %1791 = vmatmul.msk.f32.vlgmr.msra.gmra.mxu0 %vm129_vm1, %v1544_v52  ;;  %1794 = vmatmul.msk.f32.vlgmr.msrb.gmra.mxu3 %vm129_vm1, %v1544_v52 }
0x2488   :  { %v1683_v54 = vld [vmem:[#allocation2 + $0x18] sm:$0xff] }
0x2489   :  { %1795 = vmatmul.msk.f32.vlgmr.msrb.gmra.mxu0 %vm129_vm1, %v1680_v46 }
0x2491   :  { %1796 = vmatmul.msk.f32.gmra.mxu0 %vm129_vm1, %v1681_v53 }
0x2499   :  { %1797 = vmatmul.msk.f32.gmra.mxu0 %vm129_vm1, %v1682_v35 }
0x24a1   :  { %1798 = vmatmul.msk.f32.gmra.mxu0 %vm129_vm1, %v1683_v54 }
0x24fe   :  { %v1566_v55 = vpop.f32.mrf.mxu0 }
0x24ff   :  { %v1567_v36 = vadd.f32 %v1566_v55, %v2429_v27 }
0x2501   :  { %v1587_v57 = vadd.f32 %v1586_v56, %v1567_v36 }
0x2503   :  { %1901 = vtanh.f32 %v1587_v57 }
0x2504   :  { %v1651_v9 = vpop.f32.mrf.mxu3 }
0x2506   :  { %v1721_v59 = vpop.f32.mrf.mxu0 }
0x2507   :  { %v1722_v63 = vadd.f32 %v1721_v59, %v20_v58 }
0x2509   :  { %v1902_v0 = vpop.eup %1901  ;;  %1736 = vst [vmem:[%s2558_s3] sm:$0xff] %v1722_v63 }
0x250a   :  { %1594 = vrot.lane.b32.xlu0 %v1902_v0, %s1911_s30  ;;  %v1590_v14 = vmul.f32 0.5, %v1902_v0 }
0x250c   :  { %v1591_v15 = vadd.f32 0.5, %v1590_v14 }
0x250e   :  { %v1724_v1 = vpop.f32.mrf.mxu0  ;;  %v1592_v42 = vmul.f32 %v1591_v15, %v2490_v24 }
0x250f   :  { %v1725_v4 = vadd.f32 %v1724_v1, %v20_v58 }
0x2511   :  { %1737 = vst [vmem:[%s2558_s3 + $0x8] sm:$0xff] %v1725_v4 }
0x2516   :  { %v1727_v27 = vpop.f32.mrf.mxu0 }
0x2517   :  { %v1728_v8 = vadd.f32 %v1727_v27, %v20_v58 }
0x2519   :  { %1738 = vst [vmem:[%s2558_s3 + $0x10] sm:$0xff] %v1728_v8 }
0x251e   :  { %v1730_v47 = vpop.f32.mrf.mxu0 }
0x251f   :  { %v1731_v12 = vadd.f32 %v1730_v47, %v20_v58 }
0x2521   :  { %1739 = vst [vmem:[%s2558_s3 + $0x18] sm:$0xff] %v1731_v12 }
0x257c   :  { %v1595_v37 = vpop.permute.xlu0 %1594 }
0x257d   :  { %v1597_v39 = vmul.f32 %v1595_v37, %v1591_v15 }
0x257f   :  { %1599 = vrot.lane.b32.xlu1 %v1597_v39, %s1912_s4 }
0x25f1   :  { %v1600_v5 = vpop.permute.xlu1 %1599 }
0x25f2   :  { %v1602_v28 = vadd.f32 %v1600_v5, %v1592_v42 }
0x25f4   :  { %1903 = vtanh.f32 %v1602_v28 }
0x25fa   :  { %v1904_v30 = vpop.eup %1903 }
0x25fb   :  { %1605 = vrot.lane.b32.xlu2 %v1904_v30, %s1911_s30 }
0x2655   :  { %v1606_v32 = vpop.permute.xlu2 %1605 }
0x2656   :  { %v1608_v16 = vmul.f32 %v1606_v32, %v1591_v15 }
0x2658   :  { %1610 = vrot.lane.b32.xlu0 %v1608_v16, %s1912_s4 }
0x26ca   :  { %v1611_v17 = vpop.permute.xlu0 %1610 }
0x26cb   :  { %1793 = vmatmul.msk.f32.vlgmr.msrb.gmra.mxu2 %vm129_vm1, %v1611_v17 }
0x274e   :  { %v1631_v18 = vpop.f32.mrf.mxu2 }
0x274f   :  { %v1652_v19 = vadd.f32 %v1651_v9, %v1631_v18 }
0x2751   :  { %v1654_v20 = vadd.f32 %v1652_v19, %v2378_v49 }
0x2753   :  { %1905 = vtanh.f32 %v1654_v20 }
0x2759   :  { %v1906_v10 = vpop.eup %1905 }
0x275a   :  { %1660 = vrot.lane.b32.xlu1 %v1906_v10, %s1911_s30  ;;  %v1656_v21 = vmul.f32 0.5, %v1906_v10 }
0x275c   :  { %v1657_v41 = vadd.f32 0.5, %v1656_v21 }
0x275e   :  { %v1658_v24 = vmul.f32 %v1657_v41, %v2500_v45 }
0x27cc   :  { %v1661_v22 = vpop.permute.xlu1 %1660 }
0x27cd   :  { %v1663_v23 = vmul.f32 %v1661_v22, %v1657_v41 }
0x27cf   :  { %1665 = vrot.lane.b32.xlu2 %v1663_v23, %s1912_s4 }
0x2829   :  { %v1666_v25 = vpop.permute.xlu2 %1665 }
0x282a   :  { %v1668_v26 = vadd.f32 %v1666_v25, %v1658_v24 }
0x282c   :  { %1907 = vtanh.f32 %v1668_v26 }
0x2832   :  { %v1908_v29 = vpop.eup %1907 }
0x2833   :  { %1671 = vrot.lane.b32.xlu0 %v1908_v29, %s1911_s30 }
0x28a5   :  { %v1672_v48 = vpop.permute.xlu0 %1671 }
0x28a6   :  { %v1674_v49 = vmul.f32 %v1672_v48, %v1657_v41 }
0x28a8   :  { %1676 = vrot.lane.b32.xlu1 %v1674_v49, %s1912_s4 }
0x291a   :  { %v1677_v2 = vpop.permute.xlu1 %1676 }
0x291b   :  { %1679 = vst.msk [vmem:[#allocation2 + $0x20] sm:$0xff] %vm129_vm1, %v1677_v2 }
0x2922   :  { %v1684_v33 = vld [vmem:[#allocation2 + $0x20] sm:$0xff] }
0x2923   :  { %1799 = vmatmul.msk.f32.gmra.mxu0 %vm129_vm1, %v1684_v33 }
0x29a0   :  { %v1733_v60 = vpop.f32.mrf.mxu0 }
0x29a1   :  { %v1734_v34 = vadd.f32 %v1733_v60, %v20_v58 }
0x29a3   :  { %1740 = vst [vmem:[%s2558_s3 + $0x20] sm:$0xff] %v1734_v34 }

</bundles_post_ra>
